<compile_context>
chip_gen: v7x
topology: tpu7x:2x2x1
jax: 0.10.0
libtpu: 0.0.40
codegen_flags: <defaults>
</compile_context>

<pallas_src>
import numpy as np
import jax
import jax.numpy as jnp
from jax import lax
from jax.experimental import pallas as pl
from jax.experimental.pallas import tpu as pltpu


def set2set_kernel(emb_ref, mask_ref, wqh_ref, wr_ref, b_ref,
                   wpq_ref, wpr_ref, bp_ref, out_ref):
    emb = emb_ref[...]                      # (TB, n, D) f32
    TB, n, D = emb.shape

    # ---- loop-invariant work, hoisted out of the serial recurrence ----
    mask3 = mask_ref[...][:, None, :]       # (TB, 1, n) additive mask (0 / -1e5)
    wqh = wqh_ref[...]                      # (D, 4D) = W_ih[:, :D].T + W_hh.T  (q == h)
    wr = wr_ref[...]                        # (D, 4D) = W_ih[:, D:].T
    bias = jnp.broadcast_to(b_ref[...], (TB, 4 * D))   # (TB, 4D), broadcast once

    def body(step, carry):
        h, r, c = carry                     # each (TB, D) f32; h doubles as q
        # Fused LSTM gates: lane-dense (TB, 4D) result, 2 MXU matmuls per step.
        gates = (jnp.dot(h, wqh, preferred_element_type=jnp.float32)
                 + jnp.dot(r, wr, preferred_element_type=jnp.float32)
                 + bias)
        i_g = jax.nn.sigmoid(gates[:, 0 * D:1 * D])
        f_g = jax.nn.sigmoid(gates[:, 1 * D:2 * D])
        g_g = jnp.tanh(gates[:, 2 * D:3 * D])
        o_g = jax.nn.sigmoid(gates[:, 3 * D:4 * D])
        c_new = f_g * c + i_g * g_g
        h_new = o_g * jnp.tanh(c_new)       # LSTM output q == new hidden state h

        # Attention scores on the MXU: s[b,0,k] = <h_new[b], emb[b,k]>.
        s = jnp.einsum('bqd,bkd->bqk', h_new[:, None, :], emb,
                       preferred_element_type=jnp.float32)        # (TB, 1, n)
        s = s + mask3
        s = s - jnp.max(s, axis=-1, keepdims=True)
        p = jnp.exp(s)
        a = p * pl.reciprocal(jnp.sum(p, axis=-1, keepdims=True), approx=True)
        # Weighted sum on the MXU: r[b,:] = a[b,0,:] @ emb[b].
        r_new = jnp.einsum('bqk,bkd->bqd', a, emb,
                           preferred_element_type=jnp.float32)[:, 0, :]  # (TB, D)
        return (h_new, r_new, c_new)

    zeros = jnp.zeros((TB, D), jnp.float32)
    unroll = True if n <= 32 else 4
    h, r, _ = lax.fori_loop(0, n, body, (zeros, zeros, zeros), unroll=unroll)

    # Final linear head on q_star = [q, r] = [h, r].
    out_ref[...] = (jnp.dot(h, wpq_ref[...], preferred_element_type=jnp.float32)
                    + jnp.dot(r, wpr_ref[...], preferred_element_type=jnp.float32)
                    + bp_ref[...])


def _pick_batch_tile(B, n, D, emb_tile_target=12 << 20):
    """Batch tile sized so the double-buffered emb tile stays ~12 MiB: comfortable
    under v7x's 64 MiB VMEM with headroom (and trivially fine on v5e/v6e)."""
    per_row = 2 * n * D * 4                 # double-buffered f32 rows
    tb = (emb_tile_target // max(per_row, 1)) // 8 * 8
    tb = int(max(tb, 8))                    # keep sublane tiling (multiple of 8)
    return B if tb >= B else tb


def set2set_pallas(emb, mask_bool, W_ih, W_hh, b_ih, b_hh, W_pred, b_pred,
                   batch_tile=None):
    B, n, D = emb.shape
    H = 2 * D
    # nn.LSTM gate order is i,f,g,o; the module requires hidden_dim == 2*input_dim.
    assert W_ih.shape == (4 * D, H) and W_hh.shape == (4 * D, D)

    # Fold q_star = [q, r] and the q == h identity into the weights:
    #   gates = h @ (Wq + Wh) + r @ Wr + b   -> (B, 4D), columns i|f|g|o
    wqh = jnp.asarray(W_ih[:, :D].T + W_hh.T, jnp.float32)   # (D, 4D)
    wr = jnp.asarray(W_ih[:, D:].T, jnp.float32)             # (D, 4D)
    b_all = (b_ih + b_hh).reshape(1, 4 * D).astype(jnp.float32)
    wpq = jnp.asarray(W_pred[:, :D].T, jnp.float32)          # (D, D)
    wpr = jnp.asarray(W_pred[:, D:].T, jnp.float32)          # (D, D)
    bp = b_pred.reshape(1, D).astype(jnp.float32)

    # Additive softmax mask (exp underflows to exactly 0 at masked positions,
    # matching masked_fill(-100000) for any non-degenerate row) — hoisted here.
    mask_add = jnp.where(mask_bool, jnp.float32(-100000.0), jnp.float32(0.0))

    TB = batch_tile if batch_tile is not None else _pick_batch_tile(B, n, D)
    TB = min(TB, B)
    grid = (pl.cdiv(B, TB),)

    # VMEM budget: double-buffered emb/mask/out tiles + resident weights + headroom,
    # clamped to 64 MiB (v7x-safe).
    tile_bytes = 2 * (TB * n * D + TB * n + TB * D) * 4
    weight_bytes = 2 * (2 * D * 4 * D + 4 * D + 2 * D * D + D) * 4
    vmem_limit = int(min(max(2 * (tile_bytes + weight_bytes) + (4 << 20), 8 << 20),
                         64 << 20))

    const2 = lambda b: (0, 0)
    return pl.pallas_call(
        set2set_kernel,
        out_shape=jax.ShapeDtypeStruct((B, D), jnp.float32),
        grid=grid,
        in_specs=[
            pl.BlockSpec((TB, n, D), lambda b: (b, 0, 0)),   # emb: pipelined batch tile
            pl.BlockSpec((TB, n), lambda b: (b, 0)),         # additive mask tile
            pl.BlockSpec((D, 4 * D), const2),                # resident weights
            pl.BlockSpec((D, 4 * D), const2),
            pl.BlockSpec((1, 4 * D), const2),
            pl.BlockSpec((D, D), const2),
            pl.BlockSpec((D, D), const2),
            pl.BlockSpec((1, D), const2),
        ],
        out_specs=pl.BlockSpec((TB, D), lambda b: (b, 0)),
        compiler_params=pltpu.CompilerParams(
            dimension_semantics=("parallel",),
            vmem_limit_bytes=vmem_limit,
        ),
    )(emb.astype(jnp.float32), mask_add, wqh, wr, b_all, wpq, wpr, bp)


def set2set_ref(emb, mask_bool, W_ih, W_hh, b_ih, b_hh, W_pred, b_pred):
    """Pure-JAX reference that mirrors the PyTorch forward literally."""
    B, n, D = emb.shape
    H = 2 * D
    h = jnp.zeros((B, D), jnp.float32)
    c = jnp.zeros((B, D), jnp.float32)
    q_star = jnp.zeros((B, H), jnp.float32)
    for _ in range(n):
        gates = q_star @ W_ih.T + h @ W_hh.T + b_ih + b_hh
        i = jax.nn.sigmoid(gates[:, 0:D])
        f = jax.nn.sigmoid(gates[:, D:2 * D])
        g = jnp.tanh(gates[:, 2 * D:3 * D])
        o = jax.nn.sigmoid(gates[:, 3 * D:4 * D])
        c = f * c + i * g
        h = o * jnp.tanh(c)
        q = h
        e = jnp.einsum('bnd,bd->bn', emb, q)
        e = jnp.where(mask_bool, -100000.0, e)
        a = jax.nn.softmax(e, axis=1)
        r = jnp.einsum('bn,bnd->bd', a, emb)
        q_star = jnp.concatenate([q, r], axis=1)
    return q_star @ W_pred.T + b_pred


if __name__ == "__main__":
    B, n, D = 2, 8, 16          # input_dim = 16, hidden_dim = 32
    H = 2 * D

    key = jax.random.PRNGKey(0)
    k_emb, k_wih, k_whh, k_bih, k_bhh, k_wp, k_bp = jax.random.split(key, 7)

    emb = jax.random.normal(k_emb, (B, n, D), jnp.float32)
    lengths = jnp.array([8, 5], jnp.int32)
    mask_bool = jnp.arange(n)[None, :] >= lengths[:, None]   # (B, n), True = masked

    # Deterministic params (shapes of nn.LSTM(hidden_dim, input_dim) + nn.Linear)
    W_ih = 0.1 * jax.random.normal(k_wih, (4 * D, H), jnp.float32)
    W_hh = 0.1 * jax.random.normal(k_whh, (4 * D, D), jnp.float32)
    b_ih = 0.1 * jax.random.normal(k_bih, (4 * D,), jnp.float32)
    b_hh = 0.1 * jax.random.normal(k_bhh, (4 * D,), jnp.float32)
    W_pred = 0.1 * jax.random.normal(k_wp, (D, H), jnp.float32)
    b_pred = 0.1 * jax.random.normal(k_bp, (D,), jnp.float32)

    out = set2set_pallas(emb, mask_bool, W_ih, W_hh, b_ih, b_hh, W_pred, b_pred)
    out = jax.block_until_ready(out)

    ref = set2set_ref(emb, mask_bool, W_ih, W_hh, b_ih, b_hh, W_pred, b_pred)
    # Slightly looser tolerance than an exact-divide version: softmax uses the EUP
    # approximate reciprocal and the pre-summed (Wq + Wh) weight rounds differently.
    np.testing.assert_allclose(np.asarray(out), np.asarray(ref), rtol=2e-3, atol=2e-3)

    print("KERNEL_OK")
</pallas_src>

<mosaic_0001>
module attributes {stable_mosaic.version = 11 : i64} {
  func.func @set2set_kernel(%arg0: i32, %arg1: memref<2x8x16xf32, #tpu.memory_space<vmem>>, %arg2: memref<2x8xf32, #tpu.memory_space<vmem>>, %arg3: memref<16x64xf32, #tpu.memory_space<vmem>>, %arg4: memref<16x64xf32, #tpu.memory_space<vmem>>, %arg5: memref<1x64xf32, #tpu.memory_space<vmem>>, %arg6: memref<16x16xf32, #tpu.memory_space<vmem>>, %arg7: memref<16x16xf32, #tpu.memory_space<vmem>>, %arg8: memref<1x16xf32, #tpu.memory_space<vmem>>, %arg9: memref<2x16xf32, #tpu.memory_space<vmem>>) attributes {dimension_semantics = [#tpu.dimension_semantics<parallel>], iteration_bounds = array<i64: 1>, scalar_prefetch = 0 : i64, scratch_operands = 0 : i64, tpu.core_type = #tpu.core_type<tc>, window_params = [{transform_indices = @transform_0, window_bounds = array<i64: 2, 8, 16>}, {transform_indices = @transform_1, window_bounds = array<i64: 2, 8>}, {pipeline_mode = #tpu.pipeline_mode<synchronous>, transform_indices = @transform_2, window_bounds = array<i64: 16, 64>}, {pipeline_mode = #tpu.pipeline_mode<synchronous>, transform_indices = @transform_3, window_bounds = array<i64: 16, 64>}, {pipeline_mode = #tpu.pipeline_mode<synchronous>, transform_indices = @transform_4, window_bounds = array<i64: 1, 64>}, {pipeline_mode = #tpu.pipeline_mode<synchronous>, transform_indices = @transform_5, window_bounds = array<i64: 16, 16>}, {pipeline_mode = #tpu.pipeline_mode<synchronous>, transform_indices = @transform_6, window_bounds = array<i64: 16, 16>}, {pipeline_mode = #tpu.pipeline_mode<synchronous>, transform_indices = @transform_7, window_bounds = array<i64: 1, 16>}, {transform_indices = @transform_8, window_bounds = array<i64: 2, 16>}]} {
    %c0 = arith.constant 0 : index
    %c0_0 = arith.constant 0 : index
    %c0_1 = arith.constant 0 : index
    %0 = vector.load %arg1[%c0, %c0_0, %c0_1] : memref<2x8x16xf32, #tpu.memory_space<vmem>>, vector<2x8x16xf32>
    %c0_2 = arith.constant 0 : index
    %c0_3 = arith.constant 0 : index
    %1 = vector.load %arg2[%c0_2, %c0_3] : memref<2x8xf32, #tpu.memory_space<vmem>>, vector<2x8xf32>
    %2 = vector.shape_cast %1 : vector<2x8xf32> to vector<2x1x8xf32>
    %c0_4 = arith.constant 0 : index
    %c0_5 = arith.constant 0 : index
    %3 = vector.load %arg3[%c0_4, %c0_5] : memref<16x64xf32, #tpu.memory_space<vmem>>, vector<16x64xf32>
    %c0_6 = arith.constant 0 : index
    %c0_7 = arith.constant 0 : index
    %4 = vector.load %arg4[%c0_6, %c0_7] : memref<16x64xf32, #tpu.memory_space<vmem>>, vector<16x64xf32>
    %c0_8 = arith.constant 0 : index
    %c0_9 = arith.constant 0 : index
    %5 = vector.load %arg5[%c0_8, %c0_9] : memref<1x64xf32, #tpu.memory_space<vmem>>, vector<1x64xf32>
    %6 = vector.shape_cast %5 : vector<1x64xf32> to vector<1x64xf32>
    %7 = vector.broadcast %6 : vector<1x64xf32> to vector<2x64xf32>
    %cst = arith.constant 0.000000e+00 : f32
    %8 = vector.broadcast %cst : f32 to vector<2x16xf32>
    %c0_i32 = arith.constant 0 : i32
    %cst_10 = arith.constant dense<0.000000e+00> : vector<2x64xf32>
    %9 = tpu.matmul %8, %3, %cst_10 {dimension_numbers = #tpu.dot_dimension_numbers<[1], [0], [0], [1], [0, 0, 1, 1], [], []>} : vector<2x16xf32>, vector<16x64xf32>, vector<2x64xf32> -> vector<2x64xf32>
    %cst_11 = arith.constant dense<0.000000e+00> : vector<2x64xf32>
    %10 = tpu.matmul %8, %4, %cst_11 {dimension_numbers = #tpu.dot_dimension_numbers<[1], [0], [0], [1], [0, 0, 1, 1], [], []>} : vector<2x16xf32>, vector<16x64xf32>, vector<2x64xf32> -> vector<2x64xf32>
    %11 = arith.addf %9, %10 : vector<2x64xf32>
    %12 = arith.addf %11, %7 : vector<2x64xf32>
    %13 = vector.extract_strided_slice %12 {offsets = [0, 0], sizes = [2, 16], strides = [1, 1]} : vector<2x64xf32> to vector<2x16xf32>
    %14 = arith.negf %13 : vector<2x16xf32>
    %15 = math.exp %14 : vector<2x16xf32>
    %cst_12 = arith.constant 1.000000e+00 : f32
    %16 = vector.broadcast %cst_12 : f32 to vector<2x16xf32>
    %17 = arith.addf %16, %15 : vector<2x16xf32>
    %18 = arith.divf %16, %17 : vector<2x16xf32>
    %19 = vector.extract_strided_slice %12 {offsets = [0, 16], sizes = [2, 16], strides = [1, 1]} : vector<2x64xf32> to vector<2x16xf32>
    %20 = arith.negf %19 : vector<2x16xf32>
    %21 = math.exp %20 : vector<2x16xf32>
    %cst_13 = arith.constant 1.000000e+00 : f32
    %22 = vector.broadcast %cst_13 : f32 to vector<2x16xf32>
    %23 = arith.addf %22, %21 : vector<2x16xf32>
    %24 = arith.divf %22, %23 : vector<2x16xf32>
    %25 = vector.extract_strided_slice %12 {offsets = [0, 32], sizes = [2, 16], strides = [1, 1]} : vector<2x64xf32> to vector<2x16xf32>
    %26 = math.tanh %25 : vector<2x16xf32>
    %27 = vector.extract_strided_slice %12 {offsets = [0, 48], sizes = [2, 16], strides = [1, 1]} : vector<2x64xf32> to vector<2x16xf32>
    %28 = arith.negf %27 : vector<2x16xf32>
    %29 = math.exp %28 : vector<2x16xf32>
    %cst_14 = arith.constant 1.000000e+00 : f32
    %30 = vector.broadcast %cst_14 : f32 to vector<2x16xf32>
    %31 = arith.addf %30, %29 : vector<2x16xf32>
    %32 = arith.divf %30, %31 : vector<2x16xf32>
    %33 = arith.mulf %24, %8 : vector<2x16xf32>
    %34 = arith.mulf %18, %26 : vector<2x16xf32>
    %35 = arith.addf %33, %34 : vector<2x16xf32>
    %36 = math.tanh %35 : vector<2x16xf32>
    %37 = arith.mulf %32, %36 : vector<2x16xf32>
    %38 = vector.shape_cast %37 : vector<2x16xf32> to vector<2x1x16xf32>
    "tpu.trace_start"() <{level = 10 : i32, message = "bqd,bkd->bqk"}> : () -> ()
    %cst_15 = arith.constant dense<0.000000e+00> : vector<2x1x8xf32>
    %39 = tpu.matmul %38, %0, %cst_15 {dimension_numbers = #tpu.dot_dimension_numbers<[2], [2], [1], [1], [0, 0, 0, 1, 1, 1], [0], [0]>} : vector<2x1x16xf32>, vector<2x8x16xf32>, vector<2x1x8xf32> -> vector<2x1x8xf32>
    "tpu.trace_stop"() : () -> ()
    %40 = arith.addf %39, %2 : vector<2x1x8xf32>
    %cst_16 = arith.constant dense<0xFF800000> : vector<2x1xf32>
    %41 = vector.multi_reduction <maximumf>, %40, %cst_16 [2] : vector<2x1x8xf32> to vector<2x1xf32>
    %42 = vector.shape_cast %41 : vector<2x1xf32> to vector<2x1x1xf32>
    %43 = vector.broadcast %42 : vector<2x1x1xf32> to vector<2x1x8xf32>
    %44 = arith.subf %40, %43 : vector<2x1x8xf32>
    %45 = math.exp %44 : vector<2x1x8xf32>
    %cst_17 = arith.constant dense<0.000000e+00> : vector<2x1xf32>
    %46 = vector.multi_reduction <add>, %45, %cst_17 [2] : vector<2x1x8xf32> to vector<2x1xf32>
    %47 = vector.shape_cast %46 : vector<2x1xf32> to vector<2x1x1xf32>
    %48 = tpu.reciprocal %47 {approx = true} : vector<2x1x1xf32> -> vector<2x1x1xf32>
    %49 = vector.broadcast %48 : vector<2x1x1xf32> to vector<2x1x8xf32>
    %50 = arith.mulf %45, %49 : vector<2x1x8xf32>
    "tpu.trace_start"() <{level = 10 : i32, message = "bqk,bkd->bqd"}> : () -> ()
    %cst_18 = arith.constant dense<0.000000e+00> : vector<2x1x16xf32>
    %51 = tpu.matmul %50, %0, %cst_18 {dimension_numbers = #tpu.dot_dimension_numbers<[2], [1], [1], [2], [0, 0, 0, 1, 1, 2], [0], [0]>} : vector<2x1x8xf32>, vector<2x8x16xf32>, vector<2x1x16xf32> -> vector<2x1x16xf32>
    "tpu.trace_stop"() : () -> ()
    %52 = vector.shape_cast %51 : vector<2x1x16xf32> to vector<2x16xf32>
    %c1_i32 = arith.constant 1 : i32
    %cst_19 = arith.constant dense<0.000000e+00> : vector<2x64xf32>
    %53 = tpu.matmul %37, %3, %cst_19 {dimension_numbers = #tpu.dot_dimension_numbers<[1], [0], [0], [1], [0, 0, 1, 1], [], []>} : vector<2x16xf32>, vector<16x64xf32>, vector<2x64xf32> -> vector<2x64xf32>
    %cst_20 = arith.constant dense<0.000000e+00> : vector<2x64xf32>
    %54 = tpu.matmul %52, %4, %cst_20 {dimension_numbers = #tpu.dot_dimension_numbers<[1], [0], [0], [1], [0, 0, 1, 1], [], []>} : vector<2x16xf32>, vector<16x64xf32>, vector<2x64xf32> -> vector<2x64xf32>
    %55 = arith.addf %53, %54 : vector<2x64xf32>
    %56 = arith.addf %55, %7 : vector<2x64xf32>
    %57 = vector.extract_strided_slice %56 {offsets = [0, 0], sizes = [2, 16], strides = [1, 1]} : vector<2x64xf32> to vector<2x16xf32>
    %58 = arith.negf %57 : vector<2x16xf32>
    %59 = math.exp %58 : vector<2x16xf32>
    %cst_21 = arith.constant 1.000000e+00 : f32
    %60 = vector.broadcast %cst_21 : f32 to vector<2x16xf32>
    %61 = arith.addf %60, %59 : vector<2x16xf32>
    %62 = arith.divf %60, %61 : vector<2x16xf32>
    %63 = vector.extract_strided_slice %56 {offsets = [0, 16], sizes = [2, 16], strides = [1, 1]} : vector<2x64xf32> to vector<2x16xf32>
    %64 = arith.negf %63 : vector<2x16xf32>
    %65 = math.exp %64 : vector<2x16xf32>
    %cst_22 = arith.constant 1.000000e+00 : f32
    %66 = vector.broadcast %cst_22 : f32 to vector<2x16xf32>
    %67 = arith.addf %66, %65 : vector<2x16xf32>
    %68 = arith.divf %66, %67 : vector<2x16xf32>
    %69 = vector.extract_strided_slice %56 {offsets = [0, 32], sizes = [2, 16], strides = [1, 1]} : vector<2x64xf32> to vector<2x16xf32>
    %70 = math.tanh %69 : vector<2x16xf32>
    %71 = vector.extract_strided_slice %56 {offsets = [0, 48], sizes = [2, 16], strides = [1, 1]} : vector<2x64xf32> to vector<2x16xf32>
    %72 = arith.negf %71 : vector<2x16xf32>
    %73 = math.exp %72 : vector<2x16xf32>
    %cst_23 = arith.constant 1.000000e+00 : f32
    %74 = vector.broadcast %cst_23 : f32 to vector<2x16xf32>
    %75 = arith.addf %74, %73 : vector<2x16xf32>
    %76 = arith.divf %74, %75 : vector<2x16xf32>
    %77 = arith.mulf %68, %35 : vector<2x16xf32>
    %78 = arith.mulf %62, %70 : vector<2x16xf32>
    %79 = arith.addf %77, %78 : vector<2x16xf32>
    %80 = math.tanh %79 : vector<2x16xf32>
    %81 = arith.mulf %76, %80 : vector<2x16xf32>
    %82 = vector.shape_cast %81 : vector<2x16xf32> to vector<2x1x16xf32>
    "tpu.trace_start"() <{level = 10 : i32, message = "bqd,bkd->bqk"}> : () -> ()
    %cst_24 = arith.constant dense<0.000000e+00> : vector<2x1x8xf32>
    %83 = tpu.matmul %82, %0, %cst_24 {dimension_numbers = #tpu.dot_dimension_numbers<[2], [2], [1], [1], [0, 0, 0, 1, 1, 1], [0], [0]>} : vector<2x1x16xf32>, vector<2x8x16xf32>, vector<2x1x8xf32> -> vector<2x1x8xf32>
    "tpu.trace_stop"() : () -> ()
    %84 = arith.addf %83, %2 : vector<2x1x8xf32>
    %cst_25 = arith.constant dense<0xFF800000> : vector<2x1xf32>
    %85 = vector.multi_reduction <maximumf>, %84, %cst_25 [2] : vector<2x1x8xf32> to vector<2x1xf32>
    %86 = vector.shape_cast %85 : vector<2x1xf32> to vector<2x1x1xf32>
    %87 = vector.broadcast %86 : vector<2x1x1xf32> to vector<2x1x8xf32>
    %88 = arith.subf %84, %87 : vector<2x1x8xf32>
    %89 = math.exp %88 : vector<2x1x8xf32>
    %cst_26 = arith.constant dense<0.000000e+00> : vector<2x1xf32>
    %90 = vector.multi_reduction <add>, %89, %cst_26 [2] : vector<2x1x8xf32> to vector<2x1xf32>
    %91 = vector.shape_cast %90 : vector<2x1xf32> to vector<2x1x1xf32>
    %92 = tpu.reciprocal %91 {approx = true} : vector<2x1x1xf32> -> vector<2x1x1xf32>
    %93 = vector.broadcast %92 : vector<2x1x1xf32> to vector<2x1x8xf32>
    %94 = arith.mulf %89, %93 : vector<2x1x8xf32>
    "tpu.trace_start"() <{level = 10 : i32, message = "bqk,bkd->bqd"}> : () -> ()
    %cst_27 = arith.constant dense<0.000000e+00> : vector<2x1x16xf32>
    %95 = tpu.matmul %94, %0, %cst_27 {dimension_numbers = #tpu.dot_dimension_numbers<[2], [1], [1], [2], [0, 0, 0, 1, 1, 2], [0], [0]>} : vector<2x1x8xf32>, vector<2x8x16xf32>, vector<2x1x16xf32> -> vector<2x1x16xf32>
    "tpu.trace_stop"() : () -> ()
    %96 = vector.shape_cast %95 : vector<2x1x16xf32> to vector<2x16xf32>
    %c2_i32 = arith.constant 2 : i32
    %cst_28 = arith.constant dense<0.000000e+00> : vector<2x64xf32>
    %97 = tpu.matmul %81, %3, %cst_28 {dimension_numbers = #tpu.dot_dimension_numbers<[1], [0], [0], [1], [0, 0, 1, 1], [], []>} : vector<2x16xf32>, vector<16x64xf32>, vector<2x64xf32> -> vector<2x64xf32>
    %cst_29 = arith.constant dense<0.000000e+00> : vector<2x64xf32>
    %98 = tpu.matmul %96, %4, %cst_29 {dimension_numbers = #tpu.dot_dimension_numbers<[1], [0], [0], [1], [0, 0, 1, 1], [], []>} : vector<2x16xf32>, vector<16x64xf32>, vector<2x64xf32> -> vector<2x64xf32>
    %99 = arith.addf %97, %98 : vector<2x64xf32>
    %100 = arith.addf %99, %7 : vector<2x64xf32>
    %101 = vector.extract_strided_slice %100 {offsets = [0, 0], sizes = [2, 16], strides = [1, 1]} : vector<2x64xf32> to vector<2x16xf32>
    %102 = arith.negf %101 : vector<2x16xf32>
    %103 = math.exp %102 : vector<2x16xf32>
    %cst_30 = arith.constant 1.000000e+00 : f32
    %104 = vector.broadcast %cst_30 : f32 to vector<2x16xf32>
    %105 = arith.addf %104, %103 : vector<2x16xf32>
    %106 = arith.divf %104, %105 : vector<2x16xf32>
    %107 = vector.extract_strided_slice %100 {offsets = [0, 16], sizes = [2, 16], strides = [1, 1]} : vector<2x64xf32> to vector<2x16xf32>
    %108 = arith.negf %107 : vector<2x16xf32>
    %109 = math.exp %108 : vector<2x16xf32>
    %cst_31 = arith.constant 1.000000e+00 : f32
    %110 = vector.broadcast %cst_31 : f32 to vector<2x16xf32>
    %111 = arith.addf %110, %109 : vector<2x16xf32>
    %112 = arith.divf %110, %111 : vector<2x16xf32>
    %113 = vector.extract_strided_slice %100 {offsets = [0, 32], sizes = [2, 16], strides = [1, 1]} : vector<2x64xf32> to vector<2x16xf32>
    %114 = math.tanh %113 : vector<2x16xf32>
    %115 = vector.extract_strided_slice %100 {offsets = [0, 48], sizes = [2, 16], strides = [1, 1]} : vector<2x64xf32> to vector<2x16xf32>
    %116 = arith.negf %115 : vector<2x16xf32>
    %117 = math.exp %116 : vector<2x16xf32>
    %cst_32 = arith.constant 1.000000e+00 : f32
    %118 = vector.broadcast %cst_32 : f32 to vector<2x16xf32>
    %119 = arith.addf %118, %117 : vector<2x16xf32>
    %120 = arith.divf %118, %119 : vector<2x16xf32>
    %121 = arith.mulf %112, %79 : vector<2x16xf32>
    %122 = arith.mulf %106, %114 : vector<2x16xf32>
    %123 = arith.addf %121, %122 : vector<2x16xf32>
    %124 = math.tanh %123 : vector<2x16xf32>
    %125 = arith.mulf %120, %124 : vector<2x16xf32>
    %126 = vector.shape_cast %125 : vector<2x16xf32> to vector<2x1x16xf32>
    "tpu.trace_start"() <{level = 10 : i32, message = "bqd,bkd->bqk"}> : () -> ()
    %cst_33 = arith.constant dense<0.000000e+00> : vector<2x1x8xf32>
    %127 = tpu.matmul %126, %0, %cst_33 {dimension_numbers = #tpu.dot_dimension_numbers<[2], [2], [1], [1], [0, 0, 0, 1, 1, 1], [0], [0]>} : vector<2x1x16xf32>, vector<2x8x16xf32>, vector<2x1x8xf32> -> vector<2x1x8xf32>
    "tpu.trace_stop"() : () -> ()
    %128 = arith.addf %127, %2 : vector<2x1x8xf32>
    %cst_34 = arith.constant dense<0xFF800000> : vector<2x1xf32>
    %129 = vector.multi_reduction <maximumf>, %128, %cst_34 [2] : vector<2x1x8xf32> to vector<2x1xf32>
    %130 = vector.shape_cast %129 : vector<2x1xf32> to vector<2x1x1xf32>
    %131 = vector.broadcast %130 : vector<2x1x1xf32> to vector<2x1x8xf32>
    %132 = arith.subf %128, %131 : vector<2x1x8xf32>
    %133 = math.exp %132 : vector<2x1x8xf32>
    %cst_35 = arith.constant dense<0.000000e+00> : vector<2x1xf32>
    %134 = vector.multi_reduction <add>, %133, %cst_35 [2] : vector<2x1x8xf32> to vector<2x1xf32>
    %135 = vector.shape_cast %134 : vector<2x1xf32> to vector<2x1x1xf32>
    %136 = tpu.reciprocal %135 {approx = true} : vector<2x1x1xf32> -> vector<2x1x1xf32>
    %137 = vector.broadcast %136 : vector<2x1x1xf32> to vector<2x1x8xf32>
    %138 = arith.mulf %133, %137 : vector<2x1x8xf32>
    "tpu.trace_start"() <{level = 10 : i32, message = "bqk,bkd->bqd"}> : () -> ()
    %cst_36 = arith.constant dense<0.000000e+00> : vector<2x1x16xf32>
    %139 = tpu.matmul %138, %0, %cst_36 {dimension_numbers = #tpu.dot_dimension_numbers<[2], [1], [1], [2], [0, 0, 0, 1, 1, 2], [0], [0]>} : vector<2x1x8xf32>, vector<2x8x16xf32>, vector<2x1x16xf32> -> vector<2x1x16xf32>
    "tpu.trace_stop"() : () -> ()
    %140 = vector.shape_cast %139 : vector<2x1x16xf32> to vector<2x16xf32>
    %c3_i32 = arith.constant 3 : i32
    %cst_37 = arith.constant dense<0.000000e+00> : vector<2x64xf32>
    %141 = tpu.matmul %125, %3, %cst_37 {dimension_numbers = #tpu.dot_dimension_numbers<[1], [0], [0], [1], [0, 0, 1, 1], [], []>} : vector<2x16xf32>, vector<16x64xf32>, vector<2x64xf32> -> vector<2x64xf32>
    %cst_38 = arith.constant dense<0.000000e+00> : vector<2x64xf32>
    %142 = tpu.matmul %140, %4, %cst_38 {dimension_numbers = #tpu.dot_dimension_numbers<[1], [0], [0], [1], [0, 0, 1, 1], [], []>} : vector<2x16xf32>, vector<16x64xf32>, vector<2x64xf32> -> vector<2x64xf32>
    %143 = arith.addf %141, %142 : vector<2x64xf32>
    %144 = arith.addf %143, %7 : vector<2x64xf32>
    %145 = vector.extract_strided_slice %144 {offsets = [0, 0], sizes = [2, 16], strides = [1, 1]} : vector<2x64xf32> to vector<2x16xf32>
    %146 = arith.negf %145 : vector<2x16xf32>
    %147 = math.exp %146 : vector<2x16xf32>
    %cst_39 = arith.constant 1.000000e+00 : f32
    %148 = vector.broadcast %cst_39 : f32 to vector<2x16xf32>
    %149 = arith.addf %148, %147 : vector<2x16xf32>
    %150 = arith.divf %148, %149 : vector<2x16xf32>
    %151 = vector.extract_strided_slice %144 {offsets = [0, 16], sizes = [2, 16], strides = [1, 1]} : vector<2x64xf32> to vector<2x16xf32>
    %152 = arith.negf %151 : vector<2x16xf32>
    %153 = math.exp %152 : vector<2x16xf32>
    %cst_40 = arith.constant 1.000000e+00 : f32
    %154 = vector.broadcast %cst_40 : f32 to vector<2x16xf32>
    %155 = arith.addf %154, %153 : vector<2x16xf32>
    %156 = arith.divf %154, %155 : vector<2x16xf32>
    %157 = vector.extract_strided_slice %144 {offsets = [0, 32], sizes = [2, 16], strides = [1, 1]} : vector<2x64xf32> to vector<2x16xf32>
    %158 = math.tanh %157 : vector<2x16xf32>
    %159 = vector.extract_strided_slice %144 {offsets = [0, 48], sizes = [2, 16], strides = [1, 1]} : vector<2x64xf32> to vector<2x16xf32>
    %160 = arith.negf %159 : vector<2x16xf32>
    %161 = math.exp %160 : vector<2x16xf32>
    %cst_41 = arith.constant 1.000000e+00 : f32
    %162 = vector.broadcast %cst_41 : f32 to vector<2x16xf32>
    %163 = arith.addf %162, %161 : vector<2x16xf32>
    %164 = arith.divf %162, %163 : vector<2x16xf32>
    %165 = arith.mulf %156, %123 : vector<2x16xf32>
    %166 = arith.mulf %150, %158 : vector<2x16xf32>
    %167 = arith.addf %165, %166 : vector<2x16xf32>
    %168 = math.tanh %167 : vector<2x16xf32>
    %169 = arith.mulf %164, %168 : vector<2x16xf32>
    %170 = vector.shape_cast %169 : vector<2x16xf32> to vector<2x1x16xf32>
    "tpu.trace_start"() <{level = 10 : i32, message = "bqd,bkd->bqk"}> : () -> ()
    %cst_42 = arith.constant dense<0.000000e+00> : vector<2x1x8xf32>
    %171 = tpu.matmul %170, %0, %cst_42 {dimension_numbers = #tpu.dot_dimension_numbers<[2], [2], [1], [1], [0, 0, 0, 1, 1, 1], [0], [0]>} : vector<2x1x16xf32>, vector<2x8x16xf32>, vector<2x1x8xf32> -> vector<2x1x8xf32>
    "tpu.trace_stop"() : () -> ()
    %172 = arith.addf %171, %2 : vector<2x1x8xf32>
    %cst_43 = arith.constant dense<0xFF800000> : vector<2x1xf32>
    %173 = vector.multi_reduction <maximumf>, %172, %cst_43 [2] : vector<2x1x8xf32> to vector<2x1xf32>
    %174 = vector.shape_cast %173 : vector<2x1xf32> to vector<2x1x1xf32>
    %175 = vector.broadcast %174 : vector<2x1x1xf32> to vector<2x1x8xf32>
    %176 = arith.subf %172, %175 : vector<2x1x8xf32>
    %177 = math.exp %176 : vector<2x1x8xf32>
    %cst_44 = arith.constant dense<0.000000e+00> : vector<2x1xf32>
    %178 = vector.multi_reduction <add>, %177, %cst_44 [2] : vector<2x1x8xf32> to vector<2x1xf32>
    %179 = vector.shape_cast %178 : vector<2x1xf32> to vector<2x1x1xf32>
    %180 = tpu.reciprocal %179 {approx = true} : vector<2x1x1xf32> -> vector<2x1x1xf32>
    %181 = vector.broadcast %180 : vector<2x1x1xf32> to vector<2x1x8xf32>
    %182 = arith.mulf %177, %181 : vector<2x1x8xf32>
    "tpu.trace_start"() <{level = 10 : i32, message = "bqk,bkd->bqd"}> : () -> ()
    %cst_45 = arith.constant dense<0.000000e+00> : vector<2x1x16xf32>
    %183 = tpu.matmul %182, %0, %cst_45 {dimension_numbers = #tpu.dot_dimension_numbers<[2], [1], [1], [2], [0, 0, 0, 1, 1, 2], [0], [0]>} : vector<2x1x8xf32>, vector<2x8x16xf32>, vector<2x1x16xf32> -> vector<2x1x16xf32>
    "tpu.trace_stop"() : () -> ()
    %184 = vector.shape_cast %183 : vector<2x1x16xf32> to vector<2x16xf32>
    %c4_i32 = arith.constant 4 : i32
    %cst_46 = arith.constant dense<0.000000e+00> : vector<2x64xf32>
    %185 = tpu.matmul %169, %3, %cst_46 {dimension_numbers = #tpu.dot_dimension_numbers<[1], [0], [0], [1], [0, 0, 1, 1], [], []>} : vector<2x16xf32>, vector<16x64xf32>, vector<2x64xf32> -> vector<2x64xf32>
    %cst_47 = arith.constant dense<0.000000e+00> : vector<2x64xf32>
    %186 = tpu.matmul %184, %4, %cst_47 {dimension_numbers = #tpu.dot_dimension_numbers<[1], [0], [0], [1], [0, 0, 1, 1], [], []>} : vector<2x16xf32>, vector<16x64xf32>, vector<2x64xf32> -> vector<2x64xf32>
    %187 = arith.addf %185, %186 : vector<2x64xf32>
    %188 = arith.addf %187, %7 : vector<2x64xf32>
    %189 = vector.extract_strided_slice %188 {offsets = [0, 0], sizes = [2, 16], strides = [1, 1]} : vector<2x64xf32> to vector<2x16xf32>
    %190 = arith.negf %189 : vector<2x16xf32>
    %191 = math.exp %190 : vector<2x16xf32>
    %cst_48 = arith.constant 1.000000e+00 : f32
    %192 = vector.broadcast %cst_48 : f32 to vector<2x16xf32>
    %193 = arith.addf %192, %191 : vector<2x16xf32>
    %194 = arith.divf %192, %193 : vector<2x16xf32>
    %195 = vector.extract_strided_slice %188 {offsets = [0, 16], sizes = [2, 16], strides = [1, 1]} : vector<2x64xf32> to vector<2x16xf32>
    %196 = arith.negf %195 : vector<2x16xf32>
    %197 = math.exp %196 : vector<2x16xf32>
    %cst_49 = arith.constant 1.000000e+00 : f32
    %198 = vector.broadcast %cst_49 : f32 to vector<2x16xf32>
    %199 = arith.addf %198, %197 : vector<2x16xf32>
    %200 = arith.divf %198, %199 : vector<2x16xf32>
    %201 = vector.extract_strided_slice %188 {offsets = [0, 32], sizes = [2, 16], strides = [1, 1]} : vector<2x64xf32> to vector<2x16xf32>
    %202 = math.tanh %201 : vector<2x16xf32>
    %203 = vector.extract_strided_slice %188 {offsets = [0, 48], sizes = [2, 16], strides = [1, 1]} : vector<2x64xf32> to vector<2x16xf32>
    %204 = arith.negf %203 : vector<2x16xf32>
    %205 = math.exp %204 : vector<2x16xf32>
    %cst_50 = arith.constant 1.000000e+00 : f32
    %206 = vector.broadcast %cst_50 : f32 to vector<2x16xf32>
    %207 = arith.addf %206, %205 : vector<2x16xf32>
    %208 = arith.divf %206, %207 : vector<2x16xf32>
    %209 = arith.mulf %200, %167 : vector<2x16xf32>
    %210 = arith.mulf %194, %202 : vector<2x16xf32>
    %211 = arith.addf %209, %210 : vector<2x16xf32>
    %212 = math.tanh %211 : vector<2x16xf32>
    %213 = arith.mulf %208, %212 : vector<2x16xf32>
    %214 = vector.shape_cast %213 : vector<2x16xf32> to vector<2x1x16xf32>
    "tpu.trace_start"() <{level = 10 : i32, message = "bqd,bkd->bqk"}> : () -> ()
    %cst_51 = arith.constant dense<0.000000e+00> : vector<2x1x8xf32>
    %215 = tpu.matmul %214, %0, %cst_51 {dimension_numbers = #tpu.dot_dimension_numbers<[2], [2], [1], [1], [0, 0, 0, 1, 1, 1], [0], [0]>} : vector<2x1x16xf32>, vector<2x8x16xf32>, vector<2x1x8xf32> -> vector<2x1x8xf32>
    "tpu.trace_stop"() : () -> ()
    %216 = arith.addf %215, %2 : vector<2x1x8xf32>
    %cst_52 = arith.constant dense<0xFF800000> : vector<2x1xf32>
    %217 = vector.multi_reduction <maximumf>, %216, %cst_52 [2] : vector<2x1x8xf32> to vector<2x1xf32>
    %218 = vector.shape_cast %217 : vector<2x1xf32> to vector<2x1x1xf32>
    %219 = vector.broadcast %218 : vector<2x1x1xf32> to vector<2x1x8xf32>
    %220 = arith.subf %216, %219 : vector<2x1x8xf32>
    %221 = math.exp %220 : vector<2x1x8xf32>
    %cst_53 = arith.constant dense<0.000000e+00> : vector<2x1xf32>
    %222 = vector.multi_reduction <add>, %221, %cst_53 [2] : vector<2x1x8xf32> to vector<2x1xf32>
    %223 = vector.shape_cast %222 : vector<2x1xf32> to vector<2x1x1xf32>
    %224 = tpu.reciprocal %223 {approx = true} : vector<2x1x1xf32> -> vector<2x1x1xf32>
    %225 = vector.broadcast %224 : vector<2x1x1xf32> to vector<2x1x8xf32>
    %226 = arith.mulf %221, %225 : vector<2x1x8xf32>
    "tpu.trace_start"() <{level = 10 : i32, message = "bqk,bkd->bqd"}> : () -> ()
    %cst_54 = arith.constant dense<0.000000e+00> : vector<2x1x16xf32>
    %227 = tpu.matmul %226, %0, %cst_54 {dimension_numbers = #tpu.dot_dimension_numbers<[2], [1], [1], [2], [0, 0, 0, 1, 1, 2], [0], [0]>} : vector<2x1x8xf32>, vector<2x8x16xf32>, vector<2x1x16xf32> -> vector<2x1x16xf32>
    "tpu.trace_stop"() : () -> ()
    %228 = vector.shape_cast %227 : vector<2x1x16xf32> to vector<2x16xf32>
    %c5_i32 = arith.constant 5 : i32
    %cst_55 = arith.constant dense<0.000000e+00> : vector<2x64xf32>
    %229 = tpu.matmul %213, %3, %cst_55 {dimension_numbers = #tpu.dot_dimension_numbers<[1], [0], [0], [1], [0, 0, 1, 1], [], []>} : vector<2x16xf32>, vector<16x64xf32>, vector<2x64xf32> -> vector<2x64xf32>
    %cst_56 = arith.constant dense<0.000000e+00> : vector<2x64xf32>
    %230 = tpu.matmul %228, %4, %cst_56 {dimension_numbers = #tpu.dot_dimension_numbers<[1], [0], [0], [1], [0, 0, 1, 1], [], []>} : vector<2x16xf32>, vector<16x64xf32>, vector<2x64xf32> -> vector<2x64xf32>
    %231 = arith.addf %229, %230 : vector<2x64xf32>
    %232 = arith.addf %231, %7 : vector<2x64xf32>
    %233 = vector.extract_strided_slice %232 {offsets = [0, 0], sizes = [2, 16], strides = [1, 1]} : vector<2x64xf32> to vector<2x16xf32>
    %234 = arith.negf %233 : vector<2x16xf32>
    %235 = math.exp %234 : vector<2x16xf32>
    %cst_57 = arith.constant 1.000000e+00 : f32
    %236 = vector.broadcast %cst_57 : f32 to vector<2x16xf32>
    %237 = arith.addf %236, %235 : vector<2x16xf32>
    %238 = arith.divf %236, %237 : vector<2x16xf32>
    %239 = vector.extract_strided_slice %232 {offsets = [0, 16], sizes = [2, 16], strides = [1, 1]} : vector<2x64xf32> to vector<2x16xf32>
    %240 = arith.negf %239 : vector<2x16xf32>
    %241 = math.exp %240 : vector<2x16xf32>
    %cst_58 = arith.constant 1.000000e+00 : f32
    %242 = vector.broadcast %cst_58 : f32 to vector<2x16xf32>
    %243 = arith.addf %242, %241 : vector<2x16xf32>
    %244 = arith.divf %242, %243 : vector<2x16xf32>
    %245 = vector.extract_strided_slice %232 {offsets = [0, 32], sizes = [2, 16], strides = [1, 1]} : vector<2x64xf32> to vector<2x16xf32>
    %246 = math.tanh %245 : vector<2x16xf32>
    %247 = vector.extract_strided_slice %232 {offsets = [0, 48], sizes = [2, 16], strides = [1, 1]} : vector<2x64xf32> to vector<2x16xf32>
    %248 = arith.negf %247 : vector<2x16xf32>
    %249 = math.exp %248 : vector<2x16xf32>
    %cst_59 = arith.constant 1.000000e+00 : f32
    %250 = vector.broadcast %cst_59 : f32 to vector<2x16xf32>
    %251 = arith.addf %250, %249 : vector<2x16xf32>
    %252 = arith.divf %250, %251 : vector<2x16xf32>
    %253 = arith.mulf %244, %211 : vector<2x16xf32>
    %254 = arith.mulf %238, %246 : vector<2x16xf32>
    %255 = arith.addf %253, %254 : vector<2x16xf32>
    %256 = math.tanh %255 : vector<2x16xf32>
    %257 = arith.mulf %252, %256 : vector<2x16xf32>
    %258 = vector.shape_cast %257 : vector<2x16xf32> to vector<2x1x16xf32>
    "tpu.trace_start"() <{level = 10 : i32, message = "bqd,bkd->bqk"}> : () -> ()
    %cst_60 = arith.constant dense<0.000000e+00> : vector<2x1x8xf32>
    %259 = tpu.matmul %258, %0, %cst_60 {dimension_numbers = #tpu.dot_dimension_numbers<[2], [2], [1], [1], [0, 0, 0, 1, 1, 1], [0], [0]>} : vector<2x1x16xf32>, vector<2x8x16xf32>, vector<2x1x8xf32> -> vector<2x1x8xf32>
    "tpu.trace_stop"() : () -> ()
    %260 = arith.addf %259, %2 : vector<2x1x8xf32>
    %cst_61 = arith.constant dense<0xFF800000> : vector<2x1xf32>
    %261 = vector.multi_reduction <maximumf>, %260, %cst_61 [2] : vector<2x1x8xf32> to vector<2x1xf32>
    %262 = vector.shape_cast %261 : vector<2x1xf32> to vector<2x1x1xf32>
    %263 = vector.broadcast %262 : vector<2x1x1xf32> to vector<2x1x8xf32>
    %264 = arith.subf %260, %263 : vector<2x1x8xf32>
    %265 = math.exp %264 : vector<2x1x8xf32>
    %cst_62 = arith.constant dense<0.000000e+00> : vector<2x1xf32>
    %266 = vector.multi_reduction <add>, %265, %cst_62 [2] : vector<2x1x8xf32> to vector<2x1xf32>
    %267 = vector.shape_cast %266 : vector<2x1xf32> to vector<2x1x1xf32>
    %268 = tpu.reciprocal %267 {approx = true} : vector<2x1x1xf32> -> vector<2x1x1xf32>
    %269 = vector.broadcast %268 : vector<2x1x1xf32> to vector<2x1x8xf32>
    %270 = arith.mulf %265, %269 : vector<2x1x8xf32>
    "tpu.trace_start"() <{level = 10 : i32, message = "bqk,bkd->bqd"}> : () -> ()
    %cst_63 = arith.constant dense<0.000000e+00> : vector<2x1x16xf32>
    %271 = tpu.matmul %270, %0, %cst_63 {dimension_numbers = #tpu.dot_dimension_numbers<[2], [1], [1], [2], [0, 0, 0, 1, 1, 2], [0], [0]>} : vector<2x1x8xf32>, vector<2x8x16xf32>, vector<2x1x16xf32> -> vector<2x1x16xf32>
    "tpu.trace_stop"() : () -> ()
    %272 = vector.shape_cast %271 : vector<2x1x16xf32> to vector<2x16xf32>
    %c6_i32 = arith.constant 6 : i32
    %cst_64 = arith.constant dense<0.000000e+00> : vector<2x64xf32>
    %273 = tpu.matmul %257, %3, %cst_64 {dimension_numbers = #tpu.dot_dimension_numbers<[1], [0], [0], [1], [0, 0, 1, 1], [], []>} : vector<2x16xf32>, vector<16x64xf32>, vector<2x64xf32> -> vector<2x64xf32>
    %cst_65 = arith.constant dense<0.000000e+00> : vector<2x64xf32>
    %274 = tpu.matmul %272, %4, %cst_65 {dimension_numbers = #tpu.dot_dimension_numbers<[1], [0], [0], [1], [0, 0, 1, 1], [], []>} : vector<2x16xf32>, vector<16x64xf32>, vector<2x64xf32> -> vector<2x64xf32>
    %275 = arith.addf %273, %274 : vector<2x64xf32>
    %276 = arith.addf %275, %7 : vector<2x64xf32>
    %277 = vector.extract_strided_slice %276 {offsets = [0, 0], sizes = [2, 16], strides = [1, 1]} : vector<2x64xf32> to vector<2x16xf32>
    %278 = arith.negf %277 : vector<2x16xf32>
    %279 = math.exp %278 : vector<2x16xf32>
    %cst_66 = arith.constant 1.000000e+00 : f32
    %280 = vector.broadcast %cst_66 : f32 to vector<2x16xf32>
    %281 = arith.addf %280, %279 : vector<2x16xf32>
    %282 = arith.divf %280, %281 : vector<2x16xf32>
    %283 = vector.extract_strided_slice %276 {offsets = [0, 16], sizes = [2, 16], strides = [1, 1]} : vector<2x64xf32> to vector<2x16xf32>
    %284 = arith.negf %283 : vector<2x16xf32>
    %285 = math.exp %284 : vector<2x16xf32>
    %cst_67 = arith.constant 1.000000e+00 : f32
    %286 = vector.broadcast %cst_67 : f32 to vector<2x16xf32>
    %287 = arith.addf %286, %285 : vector<2x16xf32>
    %288 = arith.divf %286, %287 : vector<2x16xf32>
    %289 = vector.extract_strided_slice %276 {offsets = [0, 32], sizes = [2, 16], strides = [1, 1]} : vector<2x64xf32> to vector<2x16xf32>
    %290 = math.tanh %289 : vector<2x16xf32>
    %291 = vector.extract_strided_slice %276 {offsets = [0, 48], sizes = [2, 16], strides = [1, 1]} : vector<2x64xf32> to vector<2x16xf32>
    %292 = arith.negf %291 : vector<2x16xf32>
    %293 = math.exp %292 : vector<2x16xf32>
    %cst_68 = arith.constant 1.000000e+00 : f32
    %294 = vector.broadcast %cst_68 : f32 to vector<2x16xf32>
    %295 = arith.addf %294, %293 : vector<2x16xf32>
    %296 = arith.divf %294, %295 : vector<2x16xf32>
    %297 = arith.mulf %288, %255 : vector<2x16xf32>
    %298 = arith.mulf %282, %290 : vector<2x16xf32>
    %299 = arith.addf %297, %298 : vector<2x16xf32>
    %300 = math.tanh %299 : vector<2x16xf32>
    %301 = arith.mulf %296, %300 : vector<2x16xf32>
    %302 = vector.shape_cast %301 : vector<2x16xf32> to vector<2x1x16xf32>
    "tpu.trace_start"() <{level = 10 : i32, message = "bqd,bkd->bqk"}> : () -> ()
    %cst_69 = arith.constant dense<0.000000e+00> : vector<2x1x8xf32>
    %303 = tpu.matmul %302, %0, %cst_69 {dimension_numbers = #tpu.dot_dimension_numbers<[2], [2], [1], [1], [0, 0, 0, 1, 1, 1], [0], [0]>} : vector<2x1x16xf32>, vector<2x8x16xf32>, vector<2x1x8xf32> -> vector<2x1x8xf32>
    "tpu.trace_stop"() : () -> ()
    %304 = arith.addf %303, %2 : vector<2x1x8xf32>
    %cst_70 = arith.constant dense<0xFF800000> : vector<2x1xf32>
    %305 = vector.multi_reduction <maximumf>, %304, %cst_70 [2] : vector<2x1x8xf32> to vector<2x1xf32>
    %306 = vector.shape_cast %305 : vector<2x1xf32> to vector<2x1x1xf32>
    %307 = vector.broadcast %306 : vector<2x1x1xf32> to vector<2x1x8xf32>
    %308 = arith.subf %304, %307 : vector<2x1x8xf32>
    %309 = math.exp %308 : vector<2x1x8xf32>
    %cst_71 = arith.constant dense<0.000000e+00> : vector<2x1xf32>
    %310 = vector.multi_reduction <add>, %309, %cst_71 [2] : vector<2x1x8xf32> to vector<2x1xf32>
    %311 = vector.shape_cast %310 : vector<2x1xf32> to vector<2x1x1xf32>
    %312 = tpu.reciprocal %311 {approx = true} : vector<2x1x1xf32> -> vector<2x1x1xf32>
    %313 = vector.broadcast %312 : vector<2x1x1xf32> to vector<2x1x8xf32>
    %314 = arith.mulf %309, %313 : vector<2x1x8xf32>
    "tpu.trace_start"() <{level = 10 : i32, message = "bqk,bkd->bqd"}> : () -> ()
    %cst_72 = arith.constant dense<0.000000e+00> : vector<2x1x16xf32>
    %315 = tpu.matmul %314, %0, %cst_72 {dimension_numbers = #tpu.dot_dimension_numbers<[2], [1], [1], [2], [0, 0, 0, 1, 1, 2], [0], [0]>} : vector<2x1x8xf32>, vector<2x8x16xf32>, vector<2x1x16xf32> -> vector<2x1x16xf32>
    "tpu.trace_stop"() : () -> ()
    %316 = vector.shape_cast %315 : vector<2x1x16xf32> to vector<2x16xf32>
    %c7_i32 = arith.constant 7 : i32
    %cst_73 = arith.constant dense<0.000000e+00> : vector<2x64xf32>
    %317 = tpu.matmul %301, %3, %cst_73 {dimension_numbers = #tpu.dot_dimension_numbers<[1], [0], [0], [1], [0, 0, 1, 1], [], []>} : vector<2x16xf32>, vector<16x64xf32>, vector<2x64xf32> -> vector<2x64xf32>
    %cst_74 = arith.constant dense<0.000000e+00> : vector<2x64xf32>
    %318 = tpu.matmul %316, %4, %cst_74 {dimension_numbers = #tpu.dot_dimension_numbers<[1], [0], [0], [1], [0, 0, 1, 1], [], []>} : vector<2x16xf32>, vector<16x64xf32>, vector<2x64xf32> -> vector<2x64xf32>
    %319 = arith.addf %317, %318 : vector<2x64xf32>
    %320 = arith.addf %319, %7 : vector<2x64xf32>
    %321 = vector.extract_strided_slice %320 {offsets = [0, 0], sizes = [2, 16], strides = [1, 1]} : vector<2x64xf32> to vector<2x16xf32>
    %322 = arith.negf %321 : vector<2x16xf32>
    %323 = math.exp %322 : vector<2x16xf32>
    %cst_75 = arith.constant 1.000000e+00 : f32
    %324 = vector.broadcast %cst_75 : f32 to vector<2x16xf32>
    %325 = arith.addf %324, %323 : vector<2x16xf32>
    %326 = arith.divf %324, %325 : vector<2x16xf32>
    %327 = vector.extract_strided_slice %320 {offsets = [0, 16], sizes = [2, 16], strides = [1, 1]} : vector<2x64xf32> to vector<2x16xf32>
    %328 = arith.negf %327 : vector<2x16xf32>
    %329 = math.exp %328 : vector<2x16xf32>
    %cst_76 = arith.constant 1.000000e+00 : f32
    %330 = vector.broadcast %cst_76 : f32 to vector<2x16xf32>
    %331 = arith.addf %330, %329 : vector<2x16xf32>
    %332 = arith.divf %330, %331 : vector<2x16xf32>
    %333 = vector.extract_strided_slice %320 {offsets = [0, 32], sizes = [2, 16], strides = [1, 1]} : vector<2x64xf32> to vector<2x16xf32>
    %334 = math.tanh %333 : vector<2x16xf32>
    %335 = vector.extract_strided_slice %320 {offsets = [0, 48], sizes = [2, 16], strides = [1, 1]} : vector<2x64xf32> to vector<2x16xf32>
    %336 = arith.negf %335 : vector<2x16xf32>
    %337 = math.exp %336 : vector<2x16xf32>
    %cst_77 = arith.constant 1.000000e+00 : f32
    %338 = vector.broadcast %cst_77 : f32 to vector<2x16xf32>
    %339 = arith.addf %338, %337 : vector<2x16xf32>
    %340 = arith.divf %338, %339 : vector<2x16xf32>
    %341 = arith.mulf %332, %299 : vector<2x16xf32>
    %342 = arith.mulf %326, %334 : vector<2x16xf32>
    %343 = arith.addf %341, %342 : vector<2x16xf32>
    %344 = math.tanh %343 : vector<2x16xf32>
    %345 = arith.mulf %340, %344 : vector<2x16xf32>
    %346 = vector.shape_cast %345 : vector<2x16xf32> to vector<2x1x16xf32>
    "tpu.trace_start"() <{level = 10 : i32, message = "bqd,bkd->bqk"}> : () -> ()
    %cst_78 = arith.constant dense<0.000000e+00> : vector<2x1x8xf32>
    %347 = tpu.matmul %346, %0, %cst_78 {dimension_numbers = #tpu.dot_dimension_numbers<[2], [2], [1], [1], [0, 0, 0, 1, 1, 1], [0], [0]>} : vector<2x1x16xf32>, vector<2x8x16xf32>, vector<2x1x8xf32> -> vector<2x1x8xf32>
    "tpu.trace_stop"() : () -> ()
    %348 = arith.addf %347, %2 : vector<2x1x8xf32>
    %cst_79 = arith.constant dense<0xFF800000> : vector<2x1xf32>
    %349 = vector.multi_reduction <maximumf>, %348, %cst_79 [2] : vector<2x1x8xf32> to vector<2x1xf32>
    %350 = vector.shape_cast %349 : vector<2x1xf32> to vector<2x1x1xf32>
    %351 = vector.broadcast %350 : vector<2x1x1xf32> to vector<2x1x8xf32>
    %352 = arith.subf %348, %351 : vector<2x1x8xf32>
    %353 = math.exp %352 : vector<2x1x8xf32>
    %cst_80 = arith.constant dense<0.000000e+00> : vector<2x1xf32>
    %354 = vector.multi_reduction <add>, %353, %cst_80 [2] : vector<2x1x8xf32> to vector<2x1xf32>
    %355 = vector.shape_cast %354 : vector<2x1xf32> to vector<2x1x1xf32>
    %356 = tpu.reciprocal %355 {approx = true} : vector<2x1x1xf32> -> vector<2x1x1xf32>
    %357 = vector.broadcast %356 : vector<2x1x1xf32> to vector<2x1x8xf32>
    %358 = arith.mulf %353, %357 : vector<2x1x8xf32>
    "tpu.trace_start"() <{level = 10 : i32, message = "bqk,bkd->bqd"}> : () -> ()
    %cst_81 = arith.constant dense<0.000000e+00> : vector<2x1x16xf32>
    %359 = tpu.matmul %358, %0, %cst_81 {dimension_numbers = #tpu.dot_dimension_numbers<[2], [1], [1], [2], [0, 0, 0, 1, 1, 2], [0], [0]>} : vector<2x1x8xf32>, vector<2x8x16xf32>, vector<2x1x16xf32> -> vector<2x1x16xf32>
    "tpu.trace_stop"() : () -> ()
    %360 = vector.shape_cast %359 : vector<2x1x16xf32> to vector<2x16xf32>
    %c0_82 = arith.constant 0 : index
    %c0_83 = arith.constant 0 : index
    %361 = vector.load %arg6[%c0_82, %c0_83] : memref<16x16xf32, #tpu.memory_space<vmem>>, vector<16x16xf32>
    %cst_84 = arith.constant dense<0.000000e+00> : vector<2x16xf32>
    %362 = tpu.matmul %345, %361, %cst_84 {dimension_numbers = #tpu.dot_dimension_numbers<[1], [0], [0], [1], [0, 0, 1, 1], [], []>} : vector<2x16xf32>, vector<16x16xf32>, vector<2x16xf32> -> vector<2x16xf32>
    %c0_85 = arith.constant 0 : index
    %c0_86 = arith.constant 0 : index
    %363 = vector.load %arg7[%c0_85, %c0_86] : memref<16x16xf32, #tpu.memory_space<vmem>>, vector<16x16xf32>
    %cst_87 = arith.constant dense<0.000000e+00> : vector<2x16xf32>
    %364 = tpu.matmul %360, %363, %cst_87 {dimension_numbers = #tpu.dot_dimension_numbers<[1], [0], [0], [1], [0, 0, 1, 1], [], []>} : vector<2x16xf32>, vector<16x16xf32>, vector<2x16xf32> -> vector<2x16xf32>
    %365 = arith.addf %362, %364 : vector<2x16xf32>
    %c0_88 = arith.constant 0 : index
    %c0_89 = arith.constant 0 : index
    %366 = vector.load %arg8[%c0_88, %c0_89] : memref<1x16xf32, #tpu.memory_space<vmem>>, vector<1x16xf32>
    %367 = vector.broadcast %366 : vector<1x16xf32> to vector<2x16xf32>
    %368 = arith.addf %365, %367 : vector<2x16xf32>
    %c0_90 = arith.constant 0 : index
    %c0_91 = arith.constant 0 : index
    %369 = vector.load %arg9[%c0_90, %c0_91] : memref<2x16xf32, #tpu.memory_space<vmem>>, vector<2x16xf32>
    tpu.vector_store %arg9[%c0_90, %c0_91], %368 {strides = array<i32>} : memref<2x16xf32, #tpu.memory_space<vmem>>, vector<2x16xf32>,
    return
  }
  func.func @transform_0(%arg0: i32) -> (i32, i32, i32) {
    %c0_i32 = arith.constant 0 : i32
    %c0_i32_0 = arith.constant 0 : i32
    %c0_i32_1 = arith.constant 0 : i32
    return %arg0, %c0_i32, %c0_i32_0 : i32, i32, i32
  }
  func.func @transform_1(%arg0: i32) -> (i32, i32) {
    %c0_i32 = arith.constant 0 : i32
    %c0_i32_0 = arith.constant 0 : i32
    return %arg0, %c0_i32 : i32, i32
  }
  func.func @transform_2(%arg0: i32) -> (i32, i32) {
    %c0_i32 = arith.constant 0 : i32
    %c0_i32_0 = arith.constant 0 : i32
    %c0_i32_1 = arith.constant 0 : i32
    return %c0_i32, %c0_i32_0 : i32, i32
  }
  func.func @transform_3(%arg0: i32) -> (i32, i32) {
    %c0_i32 = arith.constant 0 : i32
    %c0_i32_0 = arith.constant 0 : i32
    %c0_i32_1 = arith.constant 0 : i32
    return %c0_i32, %c0_i32_0 : i32, i32
  }
  func.func @transform_4(%arg0: i32) -> (i32, i32) {
    %c0_i32 = arith.constant 0 : i32
    %c0_i32_0 = arith.constant 0 : i32
    %c0_i32_1 = arith.constant 0 : i32
    return %c0_i32, %c0_i32_0 : i32, i32
  }
  func.func @transform_5(%arg0: i32) -> (i32, i32) {
    %c0_i32 = arith.constant 0 : i32
    %c0_i32_0 = arith.constant 0 : i32
    %c0_i32_1 = arith.constant 0 : i32
    return %c0_i32, %c0_i32_0 : i32, i32
  }
  func.func @transform_6(%arg0: i32) -> (i32, i32) {
    %c0_i32 = arith.constant 0 : i32
    %c0_i32_0 = arith.constant 0 : i32
    %c0_i32_1 = arith.constant 0 : i32
    return %c0_i32, %c0_i32_0 : i32, i32
  }
  func.func @transform_7(%arg0: i32) -> (i32, i32) {
    %c0_i32 = arith.constant 0 : i32
    %c0_i32_0 = arith.constant 0 : i32
    %c0_i32_1 = arith.constant 0 : i32
    return %c0_i32, %c0_i32_0 : i32, i32
  }
  func.func @transform_8(%arg0: i32) -> (i32, i32) {
    %c0_i32 = arith.constant 0 : i32
    %c0_i32_0 = arith.constant 0 : i32
    return %arg0, %c0_i32 : i32, i32
  }
}

</mosaic_0001>

<bundles_post_ra>
// kernel: tpu_custom_call.1
= control target key start
LH: loop header
LB: loop body
LE: loop exit
PB: predicated region body
PF: predicated region fallthrough
CT: control target
= control target key end

     0   :  { %13 = vsyncpa [#allocation3], 0  ;;  %s5957_s0 = inlined_call_operand.hbm [shape: f32[2,8,16], index: 0, kind: input, shape index: {}]   ;;  %s5958_s1 = inlined_call_operand.vmem [shape: f32[2,8], index: 1, kind: input, shape index: {}]   ;;  %s5959_s2 = inlined_call_operand.hbm [shape: f32[16,64], index: 2, kind: input, shape index: {}]   ;;  %s5960_s3 = inlined_call_operand.hbm [shape: f32[16,64], index: 3, kind: input, shape index: {}]   ;;  %s5961_s4 = inlined_call_operand.hbm [shape: f32[1,64], index: 4, kind: input, shape index: {}]   ;;  %s5962_s5 = inlined_call_operand.vmem [shape: f32[16,16], index: 5, kind: input, shape index: {}]   ;;  %s5963_s6 = inlined_call_operand.hbm [shape: f32[16,16], index: 6, kind: input, shape index: {}]   ;;  %s5964_s7 = inlined_call_operand.vmem [shape: f32[1,16], index: 7, kind: input, shape index: {}]   ;;  %s5965_s8 = inlined_call_operand.hbm [shape: f32[2,16], index: 8, kind: output, shape index: {}]  }
   0x1   :  { %14 = vsyncpa [#allocation6], 0 }
   0x2   :  { %15 = vsyncpa [#allocation9], 0 }
   0x3   :  { %16 = vsyncpa [#allocation4], 0  ;;  %s5315_s27 = smov [#allocation5]   ;;  %s5316_s29 = smov [#allocation8]  }
   0x4   :  { %s36_s28 = sshll.u32 %s5315_s27, 4  ;;  %s61_s30 = sshll.u32 %s5316_s29, 4  ;;  %s37_s28 = int_to_ptr.vmem [resolvable:$true] %s36_s28  ;;  %s5376_s30 = int_to_ptr.vmem [resolvable:$true] %s61_s30 }
   0x5   :  { %s5175_s11 = scalar_lea.hbm %s5959_s2, 256 }
   0x6   :  { %p5176_p0 = scmp.ne.s32.totalorder %s5959_s2, %s5175_s11  ;;  %p5179_p1 = scmp.lt.u32.totalorder %s5175_s11, %s5959_s2 }
   0x8   :  { %p5181_p2 = pnand %p5179_p1, %p5176_p0 }
   0xa   :  { %5184 = shalt.err (!%p5181_p2)
}
   0xb   :  { %s5185_s16 = scalar_lea.vmem %s37_s28, 256  ;;  %p5190_p4 = scmp.lt.s32.totalorder %s37_s28, %s37_s28 }
   0xc   :  { %p5186_p3 = scmp.ne.s32.totalorder %s37_s28, %s5185_s16  ;;  %p5191_p5 = scmp.lt.s32.totalorder %s5185_s16, %s5185_s16 }
   0xe   :  { %p5192_p6 = por %p5191_p5, %p5190_p4 }
  0x10   :  { %p5193_p7 = pnand %p5192_p6, %p5186_p3 }
  0x12   :  { %5196 = shalt.err (!%p5193_p7)
}
  0x13   :  { %s5317_s17 = smov 128   ;;  %s5318_s18 = smov 8  }
  0x14   :  { %42 = dma.hbm_to_vmem [thread:$0]  %s5959_s2, 256, %s37_s28, [#allocation6], %s5317_s17, %s5317_s17, %s5318_s18  }
  0x15   :  { %s5197_s23 = scalar_lea.hbm %s5961_s4, 16 }
  0x16   :  { %p5198_p8 = scmp.ne.s32.totalorder %s5961_s4, %s5197_s23  ;;  %p5201_p9 = scmp.lt.u32.totalorder %s5197_s23, %s5961_s4 }
  0x18   :  { %p5203_p10 = pnand %p5201_p9, %p5198_p8 }
  0x1a   :  { %5206 = shalt.err (!%p5203_p10)
}
  0x1b   :  { %s5207_s29 = scalar_lea.vmem %s5376_s30, 16  ;;  %s5211_s2 = scalar_lea.vmem %s5376_s30, 32 }
  0x1c   :  { %p5208_p11 = scmp.ne.s32.totalorder %s5376_s30, %s5207_s29  ;;  %p5212_p12 = scmp.lt.s32.totalorder %s5376_s30, %s5376_s30 }
  0x1d   :  { %p5213_p13 = scmp.lt.s32.totalorder %s5211_s2, %s5207_s29 }
  0x1f   :  { %p5214_p0 = por %p5213_p13, %p5212_p12 }
  0x21   :  { %p5215_p1 = pnand %p5214_p0, %p5208_p11 }
  0x23   :  { %5218 = shalt.err (!%p5215_p1)
}
  0x24   :  { %64 = dma.hbm_to_vmem [thread:$0]  %s5961_s4, 16, %s5376_s30, [#allocation9]  }
  0x25   :  { %s5319_s10 = smov [#allocation2]   ;;  %s5320_s12 = smov [#allocation7]  }
  0x26   :  { %s22_s11 = sshll.u32 %s5319_s10, 4  ;;  %s48_s13 = sshll.u32 %s5320_s12, 4  ;;  %s23_s11 = int_to_ptr.vmem [resolvable:$true] %s22_s11  ;;  %s5411_s13 = int_to_ptr.vmem [resolvable:$true] %s48_s13 }
  0x27   :  { %s5219_s16 = scalar_lea.hbm %s5957_s0, 256 }
  0x28   :  { %p5220_p2 = scmp.ne.s32.totalorder %s5957_s0, %s5219_s16  ;;  %p5223_p3 = scmp.lt.u32.totalorder %s5219_s16, %s5957_s0 }
  0x2a   :  { %p5225_p4 = pnand %p5223_p3, %p5220_p2 }
  0x2c   :  { %5228 = shalt.err (!%p5225_p4)
}
  0x2d   :  { %s5229_s4 = scalar_lea.vmem %s23_s11, 256  ;;  %p5234_p6 = scmp.lt.s32.totalorder %s23_s11, %s23_s11 }
  0x2e   :  { %p5230_p5 = scmp.ne.s32.totalorder %s23_s11, %s5229_s4  ;;  %p5235_p7 = scmp.lt.s32.totalorder %s5229_s4, %s5229_s4 }
  0x30   :  { %p5236_p8 = por %p5235_p7, %p5234_p6 }
  0x32   :  { %p5237_p9 = pnand %p5236_p8, %p5230_p5 }
  0x34   :  { %5240 = shalt.err (!%p5237_p9)
}
  0x35   :  { %28 = dma.hbm_to_vmem [thread:$0]  %s5957_s0, 256, %s23_s11, [#allocation3], %s5317_s17, %s5317_s17, %s5318_s18  }
  0x36   :  { %s5241_s26 = scalar_lea.hbm %s5960_s3, 256 }
  0x37   :  { %p5242_p10 = scmp.ne.s32.totalorder %s5960_s3, %s5241_s26  ;;  %p5245_p11 = scmp.lt.u32.totalorder %s5241_s26, %s5960_s3 }
  0x39   :  { %p5247_p12 = pnand %p5245_p11, %p5242_p10 }
  0x3b   :  { %5250 = shalt.err (!%p5247_p12)
}
  0x3c   :  { %s5251_s9 = scalar_lea.vmem %s5411_s13, 256  ;;  %p5256_p0 = scmp.lt.s32.totalorder %s5411_s13, %s5411_s13 }
  0x3d   :  { %p5252_p13 = scmp.ne.s32.totalorder %s5411_s13, %s5251_s9  ;;  %p5257_p1 = scmp.lt.s32.totalorder %s5251_s9, %s5251_s9 }
  0x3f   :  { %p5258_p2 = por %p5257_p1, %p5256_p0 }
  0x41   :  { %p5259_p3 = pnand %p5258_p2, %p5252_p13 }
  0x43   :  { %5262 = shalt.err (!%p5259_p3)
}
  0x44   :  { %54 = dma.hbm_to_vmem [thread:$0]  %s5960_s3, 256, %s5411_s13, [#allocation6], %s5317_s17, %s5317_s17, %s5318_s18  }
  0x45   :  { %s5321_s11 = smov [#allocation10]   ;;  %s5263_s16 = scalar_lea.hbm %s5963_s6, 256 }
  0x46   :  { %s72_s12 = sshll.u32 %s5321_s11, 4  ;;  %p5264_p4 = scmp.ne.s32.totalorder %s5963_s6, %s5263_s16  ;;  %s73_s12 = int_to_ptr.vmem [resolvable:$true] %s72_s12 }
  0x47   :  { %p5267_p5 = scmp.lt.u32.totalorder %s5263_s16, %s5963_s6 }
  0x49   :  { %p5269_p6 = pnand %p5267_p5, %p5264_p4 }
  0x4b   :  { %5272 = shalt.err (!%p5269_p6)
}
  0x4c   :  { %s5273_s4 = scalar_lea.vmem %s73_s12, 256  ;;  %p5278_p8 = scmp.lt.s32.totalorder %s73_s12, %s73_s12 }
  0x4d   :  { %p5274_p7 = scmp.ne.s32.totalorder %s73_s12, %s5273_s4  ;;  %p5279_p9 = scmp.lt.s32.totalorder %s5273_s4, %s5273_s4 }
  0x4f   :  { %p5280_p10 = por %p5279_p9, %p5278_p8 }
  0x51   :  { %p5281_p11 = pnand %p5280_p10, %p5274_p7 }
  0x53   :  { %5284 = shalt.err (!%p5281_p11)
}
  0x54   :  { %78 = dma.hbm_to_vmem [thread:$0]  %s5963_s6, 256, %s73_s12, [#allocation9], %s5317_s17, %s5317_s17, %s5318_s18  }
  0x55   :  { %5307 = dma.done.wait [#allocation3], 256  }
  0x56   :  { %5308 = vsyncadd [#allocation3], 4294967040 }
  0x57   :  { %5309 = dma.done.wait [#allocation6], 512  }
  0x58   :  { %5310 = vsyncadd [#allocation6], 4294966784 }
  0x59   :  { %5311 = dma.done.wait [#allocation9], 272  }
  0x5a   :  { %5312 = vsyncadd [#allocation9], 4294967024  ;;  %v5322_v0 = vmov 0.0|0.0   ;;  %vm5323_vm0 = vmmov 0   ;;  %v5324_v1 = vmov 0.0   ;;  %v126_v2 = vld [vmem:[#allocation7] sm:$0xff]  ;;  %v111_v30 = vlaneseq }
  0x5b   :  { %4974 = vmatprep.subr.bf16.mxu0 %v5322_v0  ;;  %4977 = vmatprep.subr.bf16.mxu1 %v5322_v0  ;;  %v127_v3 = vld [vmem:[#allocation7 + $0x8] sm:$0xff]  ;;  %v124_v4 = vld [vmem:[#allocation5] sm:$0xff]  ;;  %v125_v6 = vld [vmem:[#allocation5 + $0x8] sm:$0xff]  ;;  %s5325_s6 = smov 96   ;;  %s5326_s17 = smov 16   ;;  %vm135_vm1 = vcmask 130048  }
  0x5c   :  { %4692 = vmatprep.mubr.msk.f32.mxu0 %vm5323_vm0, %v5324_v1  ;;  %4699 = vmatprep.mubr.msk.f32.mxu1 %vm5323_vm0, %v5324_v1  ;;  %v5469_v5 = vpack.c.bf16 %v127_v3, %v126_v2  ;;  %v5471_v7 = vpack.c.bf16 %v125_v6, %v124_v4  ;;  %v5483_v9 = vld [vmem:[#allocation8] ss:$0 sm:$0xff]  ;;  %v5491_v25 = vld [vmem:[#allocation2] sm:$0xff]  ;;  %v5493_v26 = vld [vmem:[#allocation2 + $0x8] sm:$0xff]  ;;  %s5327_s18 = smov 32   ;;  %v112_v32 = vshrl.u32 %v111_v30, 7 }
  0x5d   :  { %v5328_v28 = vmov 1966171168   ;;  %s5329_s30 = smov 80   ;;  %vm489_vm2 = vcmask 57344   ;;  %vm512_vm3 = vcmask 64512   ;;  %vm662_vm4 = vcmask 1041409  }
  0x5e   :  { %4976 = vmatpush3.bf16.msra.mxu0 %v5469_v5  ;;  %4979 = vmatpush3.bf16.msra.mxu1 %v5471_v7  ;;  %v109_v29 = vunpack.c.l.s4 %v5328_v28  ;;  %v5505_v37 = vsub.s32 0, %v112_v32  ;;  %v4495_v45 = vld.sshfl [vmem:[%s5958_s1] sm:$0x11 pattern:$0x75316420]  ;;  %s5330_s2 = smov [#allocation11]  }
  0x5f   :  { %4702 = vmatprep.subr.mxu0 %v5324_v1  ;;  %4707 = vmatprep.subr.mxu1 %v5324_v1  ;;  %v107_v46 = vcombine.high %v4495_v45, %v4495_v45  ;;  %s4484_s28 = sshll.u32 %s5330_s2, 4  ;;  %vm4476_vm5 = vcmask 123904   ;;  %s4485_s28 = int_to_ptr.vmem [resolvable:$true] %s4484_s28 }
  0x60   :  { %v110_v31 = vunpack.c.0.s8 %v109_v29  ;;  %s5285_s9 = scalar_lea.vmem %s4485_s28, 32  ;;  %p5290_p13 = scmp.lt.s32.totalorder %s4485_s28, %s4485_s28 }
  0x61   :  { %4693 = vmatmul.mubr.f32.vlgmr.msra.gmra.mrb[0].mxu0 %v5324_v1  ;;  %4700 = vmatmul.mubr.f32.vlgmr.msra.gmra.mrb[0].mxu1 %v5324_v1  ;;  %p5286_p12 = scmp.ne.s32.totalorder %s4485_s28, %s5285_s9  ;;  %p5291_p0 = scmp.lt.s32.totalorder %s5285_s9, %s5285_s9 }
  0x62   :  { %4704 = vmatprep.mubr.msk.f32.mxu0 %vm5323_vm0, %v5324_v1  ;;  %4709 = vmatprep.mubr.msk.f32.mxu1 %vm5323_vm0, %v5324_v1  ;;  %v5502_v33 = vsub.s32 %v110_v31, %v112_v32 }
  0x63   :  { %p5292_p1 = por %p5291_p0, %p5290_p13 }
  0x64   :  { %v5527_v47 = vrot.slane %v4495_v45, %v5502_v33  ;;  %v5530_v48 = vrot.slane %v107_v46, %v5502_v33 }
  0x65   :  { %p5293_p2 = pnand %p5292_p1, %p5286_p12 }
  0x67   :  { %4703 = vmatpush3.xpose.msk.msra.mxu0 %vm135_vm1, %v5491_v25  ;;  %4708 = vmatpush3.xpose.msk.msra.mxu1 %vm135_vm1, %v5493_v26 }
  0x68   :  { %4717 = vmatprep.subr.mxu1 %v5324_v1  ;;  %4712 = vmatprep.subr.mxu0 %v5324_v1 }
 0x134   :  { %v205_v8 = vpop.f32.mrb[0].mxu0  ;;  %v275_v10 = vpop.f32.mrb[0].mxu1 }
 0x135   :  { %v4694_v11 = vpop.f32.mrb[1].mxu0  ;;  %v276_v12 = vadd.f32 %v275_v10, %v205_v8  ;;  %v4701_v13 = vpop.f32.mrb[1].mxu1 }
 0x137   :  { %v279_v14 = vadd.f32 %v5483_v9, %v276_v12 }
 0x139   :  { %5044 = vtanh.f32 %v279_v14  ;;  %v4497_v16 = vmul.f32 -1.442695, %v279_v14 }
 0x13b   :  { %5046 = vpow2.f32 %v4497_v16 }
 0x143   :  { %v5045_v15 = vpop.eup %5044 }
 0x144   :  { %289 = vrot.lane.b32.xlu0 %v5045_v15, %s5325_s6 }
 0x145   :  { %v5047_v17 = vpop.eup %5046 }
 0x146   :  { %v283_v18 = vadd.f32 1.0, %v5047_v17 }
 0x148   :  { %5048 = vrcp.f32 %v283_v18 }
 0x152   :  { %v5049_v19 = vpop.eup %5048 }
 0x153   :  { %v287_v22 = vmul.f32 0.0, %v5049_v19 }
 0x1b6   :  { %v290_v20 = vpop.permute.xlu0 %289 }
 0x1b7   :  { %v292_v21 = vmul.f32 %v5049_v19, %v290_v20 }
 0x1b9   :  { %294 = vrot.lane.b32.xlu0 %v292_v21, %s5326_s17 }
 0x22b   :  { %v295_v23 = vpop.permute.xlu0 %294 }
 0x22c   :  { %v5488_v24 = vadd.f32 %v295_v23, %v287_v22 }
 0x22e   :  { %5050 = vtanh.f32 %v5488_v24 }
 0x238   :  { %v5051_v27 = vpop.eup %5050 }
 0x239   :  { %300 = vrot.lane.b32.xlu1 %v5051_v27, %s5327_s18 }
 0x2ab   :  { %v301_v34 = vpop.permute.xlu1 %300 }
 0x2ac   :  { %v303_v35 = vmul.f32 %v5049_v19, %v301_v34 }
 0x2ae   :  { %v311_v36 = vrot.slane %v303_v35, %v5502_v33 }
 0x2b0   :  { %v312_v38 = vcombine.high %v311_v36, %v311_v36  ;;  %v319_v39 = vrot.slane %v311_v36, %v5502_v33 }
 0x2b2   :  { %v330_v40 = vrot.slane %v319_v39, %v5505_v37  ;;  %v326_v41 = vrot.slane %v312_v38, %v5502_v33 }
 0x2b4   :  { %331 = vrot.lane.b32.xlu0 %v330_v40, %s5329_s30  ;;  %v411_v42 = vrot.slane %v326_v41, %v5505_v37 }
 0x2b6   :  { %412 = vrot.lane.b32.xlu1 %v411_v42, %s5329_s30 }
 0x326   :  { %v332_v43 = vpop.permute.xlu0 %331 }
 0x327   :  { %4705 = vmatmul.mubr.msk.f32.vlgmr.msra.gmra.mrb[2].mxu0 %vm135_vm1, %v332_v43 }
 0x328   :  { %v413_v44 = vpop.permute.xlu1 %412  ;;  %4713 = vmatpush3.msra.mxu0 %v5491_v25  ;;  %4714 = vmatprep.mubr.msk.f32.mxu0 %vm5323_vm0, %v5324_v1 }
 0x329   :  { %4710 = vmatmul.mubr.msk.f32.vlgmr.msra.gmra.mrb[2].mxu1 %vm135_vm1, %v413_v44  ;;  %4980 = vmatprep.subr.bf16.mxu0 %v5322_v0 }
 0x32a   :  { %4718 = vmatpush3.msra.mxu1 %v5493_v26  ;;  %4719 = vmatprep.mubr.msk.f32.mxu1 %vm5323_vm0, %v5324_v1 }
 0x32b   :  { %4983 = vmatprep.subr.bf16.mxu1 %v5322_v0 }
 0x3fa   :  { %v404_v49 = vpop.f32.mrb[2].mxu0 }
 0x3fb   :  { %v405_v50 = vadd.f32 %v404_v49, %v5527_v47  ;;  %v4706_v51 = vpop.f32.mrb[3].mxu0 }
 0x3fc   :  { %v485_v52 = vpop.f32.mrb[2].mxu1 }
 0x3fd   :  { %v486_v53 = vadd.f32 %v485_v52, %v5530_v48  ;;  %v4711_v54 = vpop.f32.mrb[3].mxu1  ;;  %v490_v55 = vsel %vm489_vm2, %v405_v50, -inf }
 0x3fe   :  { %491 = vmax.xlane.f32.xlu0 %v490_v55 }
 0x3ff   :  { %v493_v56 = vsel %vm489_vm2, %v486_v53, -inf }
 0x400   :  { %494 = vmax.xlane.f32.xlu1 %v493_v56 }
 0x48b   :  { %v492_v57 = vpop.xlane.xlu0 %491 }
 0x48c   :  { %v496_v58 = vsub.f32 %v405_v50, %v492_v57 }
 0x48d   :  { %v495_v59 = vpop.xlane.xlu1 %494 }
 0x48e   :  { %v498_v60 = vmul.f32 1.442695, %v496_v58  ;;  %v497_v61 = vsub.f32 %v486_v53, %v495_v59 }
 0x490   :  { %5052 = vpow2.f32 %v498_v60  ;;  %v500_v62 = vmul.f32 1.442695, %v497_v61 }
 0x492   :  { %5054 = vpow2.f32 %v500_v62 }
 0x49a   :  { %v5053_v63 = vpop.eup %5052 }
 0x49b   :  { %v502_v2 = vsel %vm489_vm2, %v5053_v63, 0.0 }
 0x49c   :  { %v5055_v3 = vpop.eup %5054  ;;  %503 = vadd.xlane.f32.xlu1 %v502_v2 }
 0x49d   :  { %v505_v4 = vsel %vm489_vm2, %v5055_v3, 0.0 }
 0x49e   :  { %506 = vadd.xlane.f32.xlu0 %v505_v4 }
 0x4b4   :  { %736 = vrot.lane.b32.xlu0 %v303_v35, %s5329_s30 }
 0x529   :  { %v504_v6 = vpop.xlane.xlu1 %503 }
 0x52a   :  { %5056 = vrcp.f32 %v504_v6 }
 0x52b   :  { %v507_v8 = vpop.xlane.xlu0 %506 }
 0x52c   :  { %5058 = vrcp.f32 %v507_v8 }
 0x52f   :  { %v737_v14 = vpop.permute.xlu0 %736 }
 0x534   :  { %v5057_v10 = vpop.eup %5056 }
 0x535   :  { %v510_v11 = vmul.f32 %v5057_v10, %v5053_v63 }
 0x536   :  { %v5059_v12 = vpop.eup %5058 }
 0x537   :  { %v511_v13 = vmul.f32 %v5059_v12, %v5055_v3  ;;  %4715 = vmatmul.mubr.msk.f32.vlgmr.msra.gmra.mrb[4].mxu0 %vm512_vm3, %v510_v11 }
 0x538   :  { %4982 = vmatpush3.bf16.msra.mxu0 %v5469_v5  ;;  %4726 = vmatprep.mubr.msk.f32.mxu0 %vm5323_vm0, %v5324_v1 }
 0x539   :  { %4720 = vmatmul.mubr.msk.f32.vlgmr.msra.gmra.mrb[4].mxu1 %vm512_vm3, %v511_v13  ;;  %4736 = vmatprep.subr.mxu0 %v5324_v1 }
 0x53a   :  { %4985 = vmatpush3.bf16.msra.mxu1 %v5471_v7  ;;  %4733 = vmatprep.mubr.msk.f32.mxu1 %vm5323_vm0, %v5324_v1 }
 0x53b   :  { %4741 = vmatprep.subr.mxu1 %v5324_v1 }
 0x53d   :  { %4734 = vmatmul.mubr.msk.f32.vlgmr.msra.gmra.mrb[6].mxu1 %vm135_vm1, %v737_v14 }
 0x53e   :  { %4743 = vmatprep.mubr.msk.f32.mxu1 %vm5323_vm0, %v5324_v1 }
 0x543   :  { %4742 = vmatpush3.xpose.msk.msra.mxu1 %vm135_vm1, %v5493_v26 }
 0x544   :  { %4751 = vmatprep.subr.mxu1 %v5324_v1 }
 0x60a   :  { %v582_v15 = vpop.f32.mrb[4].mxu0 }
 0x60b   :  { %v4716_v16 = vpop.f32.mrb[5].mxu0 }
 0x60c   :  { %v655_v17 = vpop.f32.mrb[4].mxu1 }
 0x60d   :  { %v661_v18 = vrot.slane %v655_v17, 7  ;;  %v4721_v19 = vpop.f32.mrb[5].mxu1 }
 0x60f   :  { %v663_v20 = vsel %vm662_vm4, %v661_v18, %v582_v15 }
 0x610   :  { %4727 = vmatmul.mubr.msk.f32.vlgmr.msra.gmra.mrb[6].mxu0 %vm135_vm1, %v663_v20  ;;  %v806_v21 = vpop.f32.mrb[6].mxu1 }
 0x611   :  { %v4735_v22 = vpop.f32.mrb[7].mxu1  ;;  %4737 = vmatpush3.xpose.msk.msra.mxu0 %vm135_vm1, %v5491_v25  ;;  %4738 = vmatprep.mubr.msk.f32.mxu0 %vm5323_vm0, %v5324_v1 }
 0x612   :  { %4746 = vmatprep.subr.mxu0 %v5324_v1 }
 0x6e3   :  { %v732_v23 = vpop.f32.mrb[6].mxu0 }
 0x6e4   :  { %v807_v27 = vadd.f32 %v806_v21, %v732_v23  ;;  %v4728_v28 = vpop.f32.mrb[7].mxu0 }
 0x6e6   :  { %v810_v29 = vadd.f32 %v5483_v9, %v807_v27 }
 0x6e8   :  { %5060 = vtanh.f32 %v810_v29  ;;  %v4506_v31 = vmul.f32 -1.442695, %v810_v29 }
 0x6ea   :  { %5062 = vpow2.f32 %v4506_v31 }
 0x6f2   :  { %v5061_v30 = vpop.eup %5060 }
 0x6f3   :  { %820 = vrot.lane.b32.xlu1 %v5061_v30, %s5325_s6 }
 0x6f4   :  { %v5063_v32 = vpop.eup %5062 }
 0x6f5   :  { %v814_v34 = vadd.f32 1.0, %v5063_v32 }
 0x6f7   :  { %5064 = vrcp.f32 %v814_v34 }
 0x701   :  { %v5065_v35 = vpop.eup %5064 }
 0x702   :  { %v818_v39 = vmul.f32 %v5065_v35, %v5488_v24 }
 0x765   :  { %v821_v36 = vpop.permute.xlu1 %820 }
 0x766   :  { %v823_v38 = vmul.f32 %v5065_v35, %v821_v36 }
 0x768   :  { %825 = vrot.lane.b32.xlu1 %v823_v38, %s5326_s17 }
 0x7da   :  { %v826_v40 = vpop.permute.xlu1 %825 }
 0x7db   :  { %v5566_v41 = vadd.f32 %v826_v40, %v818_v39 }
 0x7dd   :  { %5066 = vtanh.f32 %v5566_v41 }
 0x7e7   :  { %v5067_v42 = vpop.eup %5066 }
 0x7e8   :  { %831 = vrot.lane.b32.xlu0 %v5067_v42, %s5327_s18 }
 0x85a   :  { %v832_v43 = vpop.permute.xlu0 %831 }
 0x85b   :  { %v834_v44 = vmul.f32 %v5065_v35, %v832_v43 }
 0x85d   :  { %v842_v45 = vrot.slane %v834_v44, %v5502_v33 }
 0x85f   :  { %v843_v46 = vcombine.high %v842_v45, %v842_v45  ;;  %v850_v49 = vrot.slane %v842_v45, %v5502_v33 }
 0x861   :  { %v861_v50 = vrot.slane %v850_v49, %v5505_v37  ;;  %v857_v51 = vrot.slane %v843_v46, %v5502_v33 }
 0x863   :  { %862 = vrot.lane.b32.xlu0 %v861_v50, %s5329_s30  ;;  %v939_v24 = vrot.slane %v857_v51, %v5505_v37 }
 0x865   :  { %940 = vrot.lane.b32.xlu1 %v939_v24, %s5329_s30 }
 0x8d5   :  { %v863_v52 = vpop.permute.xlu0 %862 }
 0x8d6   :  { %4739 = vmatmul.mubr.msk.f32.vlgmr.msra.gmra.mrb[8].mxu0 %vm135_vm1, %v863_v52 }
 0x8d7   :  { %v941_v53 = vpop.permute.xlu1 %940  ;;  %4747 = vmatpush3.msra.mxu0 %v5491_v25  ;;  %4748 = vmatprep.mubr.msk.f32.mxu0 %vm5323_vm0, %v5324_v1 }
 0x8d8   :  { %4744 = vmatmul.mubr.msk.f32.vlgmr.msra.gmra.mrb[8].mxu1 %vm135_vm1, %v941_v53  ;;  %4986 = vmatprep.subr.bf16.mxu0 %v5322_v0 }
 0x8d9   :  { %4752 = vmatpush3.msra.mxu1 %v5493_v26  ;;  %4753 = vmatprep.mubr.msk.f32.mxu1 %vm5323_vm0, %v5324_v1 }
 0x8da   :  { %4989 = vmatprep.subr.bf16.mxu1 %v5322_v0 }
 0x9a9   :  { %v932_v54 = vpop.f32.mrb[8].mxu0 }
 0x9aa   :  { %v933_v55 = vadd.f32 %v932_v54, %v5527_v47  ;;  %v4740_v56 = vpop.f32.mrb[9].mxu0 }
 0x9ab   :  { %v1010_v57 = vpop.f32.mrb[8].mxu1 }
 0x9ac   :  { %v1011_v58 = vadd.f32 %v1010_v57, %v5530_v48  ;;  %v4745_v59 = vpop.f32.mrb[9].mxu1  ;;  %v1014_v60 = vsel %vm489_vm2, %v933_v55, -inf }
 0x9ad   :  { %1015 = vmax.xlane.f32.xlu0 %v1014_v60 }
 0x9ae   :  { %v1017_v61 = vsel %vm489_vm2, %v1011_v58, -inf }
 0x9af   :  { %1018 = vmax.xlane.f32.xlu1 %v1017_v61 }
 0xa3a   :  { %v1016_v62 = vpop.xlane.xlu0 %1015 }
 0xa3b   :  { %v1020_v63 = vsub.f32 %v933_v55, %v1016_v62 }
 0xa3c   :  { %v1019_v2 = vpop.xlane.xlu1 %1018 }
 0xa3d   :  { %v1022_v3 = vmul.f32 1.442695, %v1020_v63  ;;  %v1021_v4 = vsub.f32 %v1011_v58, %v1019_v2 }
 0xa3f   :  { %5068 = vpow2.f32 %v1022_v3  ;;  %v1024_v6 = vmul.f32 1.442695, %v1021_v4 }
 0xa41   :  { %5070 = vpow2.f32 %v1024_v6 }
 0xa49   :  { %v5069_v8 = vpop.eup %5068 }
 0xa4a   :  { %v1026_v10 = vsel %vm489_vm2, %v5069_v8, 0.0 }
 0xa4b   :  { %v5071_v11 = vpop.eup %5070  ;;  %1027 = vadd.xlane.f32.xlu1 %v1026_v10 }
 0xa4c   :  { %v1029_v12 = vsel %vm489_vm2, %v5071_v11, 0.0 }
 0xa4d   :  { %1030 = vadd.xlane.f32.xlu0 %v1029_v12 }
 0xa63   :  { %1258 = vrot.lane.b32.xlu0 %v834_v44, %s5329_s30 }
 0xad8   :  { %v1028_v13 = vpop.xlane.xlu1 %1027 }
 0xad9   :  { %5072 = vrcp.f32 %v1028_v13 }
 0xada   :  { %v1031_v14 = vpop.xlane.xlu0 %1030 }
 0xadb   :  { %5074 = vrcp.f32 %v1031_v14 }
 0xade   :  { %v1259_v19 = vpop.permute.xlu0 %1258 }
 0xae3   :  { %v5073_v15 = vpop.eup %5072 }
 0xae4   :  { %v1034_v16 = vmul.f32 %v5073_v15, %v5069_v8 }
 0xae5   :  { %v5075_v17 = vpop.eup %5074 }
 0xae6   :  { %v1035_v18 = vmul.f32 %v5075_v17, %v5071_v11  ;;  %4749 = vmatmul.mubr.msk.f32.vlgmr.msra.gmra.mrb[10].mxu0 %vm512_vm3, %v1034_v16 }
 0xae7   :  { %4988 = vmatpush3.bf16.msra.mxu0 %v5469_v5  ;;  %4760 = vmatprep.mubr.msk.f32.mxu0 %vm5323_vm0, %v5324_v1 }
 0xae8   :  { %4754 = vmatmul.mubr.msk.f32.vlgmr.msra.gmra.mrb[10].mxu1 %vm512_vm3, %v1035_v18  ;;  %4770 = vmatprep.subr.mxu0 %v5324_v1 }
 0xae9   :  { %4991 = vmatpush3.bf16.msra.mxu1 %v5471_v7  ;;  %4767 = vmatprep.mubr.msk.f32.mxu1 %vm5323_vm0, %v5324_v1 }
 0xaea   :  { %4775 = vmatprep.subr.mxu1 %v5324_v1 }
 0xaec   :  { %4768 = vmatmul.mubr.msk.f32.vlgmr.msra.gmra.mrb[12].mxu1 %vm135_vm1, %v1259_v19 }
 0xaed   :  { %4777 = vmatprep.mubr.msk.f32.mxu1 %vm5323_vm0, %v5324_v1 }
 0xaf2   :  { %4776 = vmatpush3.xpose.msk.msra.mxu1 %vm135_vm1, %v5493_v26 }
 0xaf3   :  { %4785 = vmatprep.subr.mxu1 %v5324_v1 }
 0xbb9   :  { %v1105_v20 = vpop.f32.mrb[10].mxu0 }
 0xbba   :  { %v4750_v21 = vpop.f32.mrb[11].mxu0 }
 0xbbb   :  { %v1178_v22 = vpop.f32.mrb[10].mxu1 }
 0xbbc   :  { %v1184_v23 = vrot.slane %v1178_v22, 7  ;;  %v4755_v27 = vpop.f32.mrb[11].mxu1 }
 0xbbe   :  { %v1185_v28 = vsel %vm662_vm4, %v1184_v23, %v1105_v20 }
 0xbbf   :  { %4761 = vmatmul.mubr.msk.f32.vlgmr.msra.gmra.mrb[12].mxu0 %vm135_vm1, %v1185_v28  ;;  %v1328_v29 = vpop.f32.mrb[12].mxu1 }
 0xbc0   :  { %v4769_v30 = vpop.f32.mrb[13].mxu1  ;;  %4771 = vmatpush3.xpose.msk.msra.mxu0 %vm135_vm1, %v5491_v25  ;;  %4772 = vmatprep.mubr.msk.f32.mxu0 %vm5323_vm0, %v5324_v1 }
 0xbc1   :  { %4780 = vmatprep.subr.mxu0 %v5324_v1 }
 0xc92   :  { %v1254_v31 = vpop.f32.mrb[12].mxu0 }
 0xc93   :  { %v1329_v32 = vadd.f32 %v1328_v29, %v1254_v31  ;;  %v4762_v34 = vpop.f32.mrb[13].mxu0 }
 0xc95   :  { %v1332_v35 = vadd.f32 %v5483_v9, %v1329_v32 }
 0xc97   :  { %5076 = vtanh.f32 %v1332_v35  ;;  %v4515_v38 = vmul.f32 -1.442695, %v1332_v35 }
 0xc99   :  { %5078 = vpow2.f32 %v4515_v38 }
 0xca1   :  { %v5077_v36 = vpop.eup %5076 }
 0xca2   :  { %1342 = vrot.lane.b32.xlu1 %v5077_v36, %s5325_s6 }
 0xca3   :  { %v5079_v39 = vpop.eup %5078 }
 0xca4   :  { %v1336_v40 = vadd.f32 1.0, %v5079_v39 }
 0xca6   :  { %5080 = vrcp.f32 %v1336_v40 }
 0xcb0   :  { %v5081_v42 = vpop.eup %5080 }
 0xcb1   :  { %v1340_v45 = vmul.f32 %v5081_v42, %v5566_v41 }
 0xd14   :  { %v1343_v43 = vpop.permute.xlu1 %1342 }
 0xd15   :  { %v1345_v44 = vmul.f32 %v5081_v42, %v1343_v43 }
 0xd17   :  { %1347 = vrot.lane.b32.xlu1 %v1345_v44, %s5326_s17 }
 0xd89   :  { %v1348_v46 = vpop.permute.xlu1 %1347 }
 0xd8a   :  { %v5621_v49 = vadd.f32 %v1348_v46, %v1340_v45 }
 0xd8c   :  { %5082 = vtanh.f32 %v5621_v49 }
 0xd96   :  { %v5083_v50 = vpop.eup %5082 }
 0xd97   :  { %1353 = vrot.lane.b32.xlu0 %v5083_v50, %s5327_s18 }
 0xe09   :  { %v1354_v51 = vpop.permute.xlu0 %1353 }
 0xe0a   :  { %v1356_v24 = vmul.f32 %v5081_v42, %v1354_v51 }
 0xe0c   :  { %v1364_v52 = vrot.slane %v1356_v24, %v5502_v33 }
 0xe0e   :  { %v1365_v53 = vcombine.high %v1364_v52, %v1364_v52  ;;  %v1372_v54 = vrot.slane %v1364_v52, %v5502_v33 }
 0xe10   :  { %v1383_v55 = vrot.slane %v1372_v54, %v5505_v37  ;;  %v1379_v56 = vrot.slane %v1365_v53, %v5502_v33 }
 0xe12   :  { %1384 = vrot.lane.b32.xlu0 %v1383_v55, %s5329_s30  ;;  %v1461_v41 = vrot.slane %v1379_v56, %v5505_v37 }
 0xe14   :  { %1462 = vrot.lane.b32.xlu1 %v1461_v41, %s5329_s30 }
 0xe84   :  { %v1385_v57 = vpop.permute.xlu0 %1384 }
 0xe85   :  { %4773 = vmatmul.mubr.msk.f32.vlgmr.msra.gmra.mrb[14].mxu0 %vm135_vm1, %v1385_v57 }
 0xe86   :  { %v1463_v58 = vpop.permute.xlu1 %1462  ;;  %4781 = vmatpush3.msra.mxu0 %v5491_v25  ;;  %4782 = vmatprep.mubr.msk.f32.mxu0 %vm5323_vm0, %v5324_v1 }
 0xe87   :  { %4778 = vmatmul.mubr.msk.f32.vlgmr.msra.gmra.mrb[14].mxu1 %vm135_vm1, %v1463_v58  ;;  %4992 = vmatprep.subr.bf16.mxu0 %v5322_v0 }
 0xe88   :  { %4786 = vmatpush3.msra.mxu1 %v5493_v26  ;;  %4787 = vmatprep.mubr.msk.f32.mxu1 %vm5323_vm0, %v5324_v1 }
 0xe89   :  { %4995 = vmatprep.subr.bf16.mxu1 %v5322_v0 }
 0xf58   :  { %v1454_v59 = vpop.f32.mrb[14].mxu0 }
 0xf59   :  { %v1455_v60 = vadd.f32 %v1454_v59, %v5527_v47  ;;  %v4774_v61 = vpop.f32.mrb[15].mxu0 }
 0xf5a   :  { %v1532_v62 = vpop.f32.mrb[14].mxu1 }
 0xf5b   :  { %v1533_v63 = vadd.f32 %v1532_v62, %v5530_v48  ;;  %v4779_v2 = vpop.f32.mrb[15].mxu1  ;;  %v1536_v3 = vsel %vm489_vm2, %v1455_v60, -inf }
 0xf5c   :  { %1537 = vmax.xlane.f32.xlu0 %v1536_v3 }
 0xf5d   :  { %v1539_v4 = vsel %vm489_vm2, %v1533_v63, -inf }
 0xf5e   :  { %1540 = vmax.xlane.f32.xlu1 %v1539_v4 }
 0xfe9   :  { %v1538_v6 = vpop.xlane.xlu0 %1537 }
 0xfea   :  { %v1542_v8 = vsub.f32 %v1455_v60, %v1538_v6 }
 0xfeb   :  { %v1541_v10 = vpop.xlane.xlu1 %1540 }
 0xfec   :  { %v1544_v11 = vmul.f32 1.442695, %v1542_v8  ;;  %v1543_v12 = vsub.f32 %v1533_v63, %v1541_v10 }
 0xfee   :  { %5084 = vpow2.f32 %v1544_v11  ;;  %v1546_v13 = vmul.f32 1.442695, %v1543_v12 }
 0xff0   :  { %5086 = vpow2.f32 %v1546_v13 }
 0xff8   :  { %v5085_v14 = vpop.eup %5084 }
 0xff9   :  { %v1548_v15 = vsel %vm489_vm2, %v5085_v14, 0.0 }
 0xffa   :  { %v5087_v16 = vpop.eup %5086  ;;  %1549 = vadd.xlane.f32.xlu1 %v1548_v15 }
 0xffb   :  { %v1551_v17 = vsel %vm489_vm2, %v5087_v16, 0.0 }
 0xffc   :  { %1552 = vadd.xlane.f32.xlu0 %v1551_v17 }
0x1012   :  { %1780 = vrot.lane.b32.xlu0 %v1356_v24, %s5329_s30 }
0x1087   :  { %v1550_v18 = vpop.xlane.xlu1 %1549 }
0x1088   :  { %5088 = vrcp.f32 %v1550_v18 }
0x1089   :  { %v1553_v19 = vpop.xlane.xlu0 %1552 }
0x108a   :  { %5090 = vrcp.f32 %v1553_v19 }
0x108d   :  { %v1781_v27 = vpop.permute.xlu0 %1780 }
0x1092   :  { %v5089_v20 = vpop.eup %5088 }
0x1093   :  { %v1556_v21 = vmul.f32 %v5089_v20, %v5085_v14 }
0x1094   :  { %v5091_v22 = vpop.eup %5090 }
0x1095   :  { %v1557_v23 = vmul.f32 %v5091_v22, %v5087_v16  ;;  %4783 = vmatmul.mubr.msk.f32.vlgmr.msra.gmra.mrb[16].mxu0 %vm512_vm3, %v1556_v21 }
0x1096   :  { %4994 = vmatpush3.bf16.msra.mxu0 %v5469_v5  ;;  %4794 = vmatprep.mubr.msk.f32.mxu0 %vm5323_vm0, %v5324_v1 }
0x1097   :  { %4788 = vmatmul.mubr.msk.f32.vlgmr.msra.gmra.mrb[16].mxu1 %vm512_vm3, %v1557_v23  ;;  %4804 = vmatprep.subr.mxu0 %v5324_v1 }
0x1098   :  { %4997 = vmatpush3.bf16.msra.mxu1 %v5471_v7  ;;  %4801 = vmatprep.mubr.msk.f32.mxu1 %vm5323_vm0, %v5324_v1 }
0x1099   :  { %4809 = vmatprep.subr.mxu1 %v5324_v1 }
0x109b   :  { %4802 = vmatmul.mubr.msk.f32.vlgmr.msra.gmra.mrb[18].mxu1 %vm135_vm1, %v1781_v27 }
0x109c   :  { %4811 = vmatprep.mubr.msk.f32.mxu1 %vm5323_vm0, %v5324_v1 }
0x10a1   :  { %4810 = vmatpush3.xpose.msk.msra.mxu1 %vm135_vm1, %v5493_v26 }
0x10a2   :  { %4819 = vmatprep.subr.mxu1 %v5324_v1 }
0x1168   :  { %v1627_v28 = vpop.f32.mrb[16].mxu0 }
0x1169   :  { %v4784_v29 = vpop.f32.mrb[17].mxu0 }
0x116a   :  { %v1700_v30 = vpop.f32.mrb[16].mxu1 }
0x116b   :  { %v1706_v31 = vrot.slane %v1700_v30, 7  ;;  %v4789_v32 = vpop.f32.mrb[17].mxu1 }
0x116d   :  { %v1707_v34 = vsel %vm662_vm4, %v1706_v31, %v1627_v28 }
0x116e   :  { %4795 = vmatmul.mubr.msk.f32.vlgmr.msra.gmra.mrb[18].mxu0 %vm135_vm1, %v1707_v34  ;;  %v1850_v35 = vpop.f32.mrb[18].mxu1 }
0x116f   :  { %v4803_v36 = vpop.f32.mrb[19].mxu1  ;;  %4805 = vmatpush3.xpose.msk.msra.mxu0 %vm135_vm1, %v5491_v25  ;;  %4806 = vmatprep.mubr.msk.f32.mxu0 %vm5323_vm0, %v5324_v1 }
0x1170   :  { %4814 = vmatprep.subr.mxu0 %v5324_v1 }
0x1241   :  { %v1776_v38 = vpop.f32.mrb[18].mxu0 }
0x1242   :  { %v1851_v39 = vadd.f32 %v1850_v35, %v1776_v38  ;;  %v4796_v40 = vpop.f32.mrb[19].mxu0 }
0x1244   :  { %v1854_v42 = vadd.f32 %v5483_v9, %v1851_v39 }
0x1246   :  { %5092 = vtanh.f32 %v1854_v42  ;;  %v4524_v44 = vmul.f32 -1.442695, %v1854_v42 }
0x1248   :  { %5094 = vpow2.f32 %v4524_v44 }
0x1250   :  { %v5093_v43 = vpop.eup %5092 }
0x1251   :  { %1864 = vrot.lane.b32.xlu1 %v5093_v43, %s5325_s6 }
0x1252   :  { %v5095_v45 = vpop.eup %5094 }
0x1253   :  { %v1858_v46 = vadd.f32 1.0, %v5095_v45 }
0x1255   :  { %5096 = vrcp.f32 %v1858_v46 }
0x125f   :  { %v5097_v50 = vpop.eup %5096 }
0x1260   :  { %v1862_v52 = vmul.f32 %v5097_v50, %v5621_v49 }
0x12c3   :  { %v1865_v51 = vpop.permute.xlu1 %1864 }
0x12c4   :  { %v1867_v24 = vmul.f32 %v5097_v50, %v1865_v51 }
0x12c6   :  { %1869 = vrot.lane.b32.xlu1 %v1867_v24, %s5326_s17 }
0x1338   :  { %v1870_v53 = vpop.permute.xlu1 %1869 }
0x1339   :  { %v5676_v54 = vadd.f32 %v1870_v53, %v1862_v52 }
0x133b   :  { %5098 = vtanh.f32 %v5676_v54 }
0x1345   :  { %v5099_v55 = vpop.eup %5098 }
0x1346   :  { %1875 = vrot.lane.b32.xlu0 %v5099_v55, %s5327_s18 }
0x13b8   :  { %v1876_v56 = vpop.permute.xlu0 %1875 }
0x13b9   :  { %v1878_v41 = vmul.f32 %v5097_v50, %v1876_v56 }
0x13bb   :  { %v1886_v57 = vrot.slane %v1878_v41, %v5502_v33 }
0x13bd   :  { %v1887_v58 = vcombine.high %v1886_v57, %v1886_v57  ;;  %v1894_v59 = vrot.slane %v1886_v57, %v5502_v33 }
0x13bf   :  { %v1905_v60 = vrot.slane %v1894_v59, %v5505_v37  ;;  %v1901_v61 = vrot.slane %v1887_v58, %v5502_v33 }
0x13c1   :  { %1906 = vrot.lane.b32.xlu0 %v1905_v60, %s5329_s30  ;;  %v1983_v49 = vrot.slane %v1901_v61, %v5505_v37 }
0x13c3   :  { %1984 = vrot.lane.b32.xlu1 %v1983_v49, %s5329_s30 }
0x1433   :  { %v1907_v62 = vpop.permute.xlu0 %1906 }
0x1434   :  { %4807 = vmatmul.mubr.msk.f32.vlgmr.msra.gmra.mrb[20].mxu0 %vm135_vm1, %v1907_v62 }
0x1435   :  { %v1985_v63 = vpop.permute.xlu1 %1984  ;;  %4815 = vmatpush3.msra.mxu0 %v5491_v25  ;;  %4816 = vmatprep.mubr.msk.f32.mxu0 %vm5323_vm0, %v5324_v1 }
0x1436   :  { %4812 = vmatmul.mubr.msk.f32.vlgmr.msra.gmra.mrb[20].mxu1 %vm135_vm1, %v1985_v63  ;;  %4998 = vmatprep.subr.bf16.mxu0 %v5322_v0 }
0x1437   :  { %4820 = vmatpush3.msra.mxu1 %v5493_v26  ;;  %4821 = vmatprep.mubr.msk.f32.mxu1 %vm5323_vm0, %v5324_v1 }
0x1438   :  { %5001 = vmatprep.subr.bf16.mxu1 %v5322_v0 }
0x1507   :  { %v1976_v2 = vpop.f32.mrb[20].mxu0 }
0x1508   :  { %v1977_v3 = vadd.f32 %v1976_v2, %v5527_v47  ;;  %v4808_v4 = vpop.f32.mrb[21].mxu0 }
0x1509   :  { %v2054_v6 = vpop.f32.mrb[20].mxu1 }
0x150a   :  { %v2055_v8 = vadd.f32 %v2054_v6, %v5530_v48  ;;  %v4813_v10 = vpop.f32.mrb[21].mxu1  ;;  %v2058_v11 = vsel %vm489_vm2, %v1977_v3, -inf }
0x150b   :  { %2059 = vmax.xlane.f32.xlu0 %v2058_v11 }
0x150c   :  { %v2061_v12 = vsel %vm489_vm2, %v2055_v8, -inf }
0x150d   :  { %2062 = vmax.xlane.f32.xlu1 %v2061_v12 }
0x1598   :  { %v2060_v13 = vpop.xlane.xlu0 %2059 }
0x1599   :  { %v2064_v14 = vsub.f32 %v1977_v3, %v2060_v13 }
0x159a   :  { %v2063_v15 = vpop.xlane.xlu1 %2062 }
0x159b   :  { %v2066_v16 = vmul.f32 1.442695, %v2064_v14  ;;  %v2065_v17 = vsub.f32 %v2055_v8, %v2063_v15 }
0x159d   :  { %5100 = vpow2.f32 %v2066_v16  ;;  %v2068_v18 = vmul.f32 1.442695, %v2065_v17 }
0x159f   :  { %5102 = vpow2.f32 %v2068_v18 }
0x15a7   :  { %v5101_v19 = vpop.eup %5100 }
0x15a8   :  { %v2070_v20 = vsel %vm489_vm2, %v5101_v19, 0.0 }
0x15a9   :  { %v5103_v21 = vpop.eup %5102  ;;  %2071 = vadd.xlane.f32.xlu1 %v2070_v20 }
0x15aa   :  { %v2073_v22 = vsel %vm489_vm2, %v5103_v21, 0.0 }
0x15ab   :  { %2074 = vadd.xlane.f32.xlu0 %v2073_v22 }
0x15c1   :  { %2302 = vrot.lane.b32.xlu0 %v1878_v41, %s5329_s30 }
0x1636   :  { %v2072_v23 = vpop.xlane.xlu1 %2071 }
0x1637   :  { %5104 = vrcp.f32 %v2072_v23 }
0x1638   :  { %v2075_v27 = vpop.xlane.xlu0 %2074 }
0x1639   :  { %5106 = vrcp.f32 %v2075_v27 }
0x163c   :  { %v2303_v32 = vpop.permute.xlu0 %2302 }
0x1641   :  { %v5105_v28 = vpop.eup %5104 }
0x1642   :  { %v2078_v29 = vmul.f32 %v5105_v28, %v5101_v19 }
0x1643   :  { %v5107_v30 = vpop.eup %5106 }
0x1644   :  { %v2079_v31 = vmul.f32 %v5107_v30, %v5103_v21  ;;  %4817 = vmatmul.mubr.msk.f32.vlgmr.msra.gmra.mrb[22].mxu0 %vm512_vm3, %v2078_v29 }
0x1645   :  { %5000 = vmatpush3.bf16.msra.mxu0 %v5469_v5  ;;  %4828 = vmatprep.mubr.msk.f32.mxu0 %vm5323_vm0, %v5324_v1 }
0x1646   :  { %4822 = vmatmul.mubr.msk.f32.vlgmr.msra.gmra.mrb[22].mxu1 %vm512_vm3, %v2079_v31  ;;  %4838 = vmatprep.subr.mxu0 %v5324_v1 }
0x1647   :  { %5003 = vmatpush3.bf16.msra.mxu1 %v5471_v7  ;;  %4835 = vmatprep.mubr.msk.f32.mxu1 %vm5323_vm0, %v5324_v1 }
0x1648   :  { %4843 = vmatprep.subr.mxu1 %v5324_v1 }
0x164a   :  { %4836 = vmatmul.mubr.msk.f32.vlgmr.msra.gmra.mrb[24].mxu1 %vm135_vm1, %v2303_v32 }
0x164b   :  { %4845 = vmatprep.mubr.msk.f32.mxu1 %vm5323_vm0, %v5324_v1 }
0x1650   :  { %4844 = vmatpush3.xpose.msk.msra.mxu1 %vm135_vm1, %v5493_v26 }
0x1651   :  { %4853 = vmatprep.subr.mxu1 %v5324_v1 }
0x1717   :  { %v2149_v34 = vpop.f32.mrb[22].mxu0 }
0x1718   :  { %v4818_v35 = vpop.f32.mrb[23].mxu0 }
0x1719   :  { %v2222_v36 = vpop.f32.mrb[22].mxu1 }
0x171a   :  { %v2228_v38 = vrot.slane %v2222_v36, 7  ;;  %v4823_v39 = vpop.f32.mrb[23].mxu1 }
0x171c   :  { %v2229_v40 = vsel %vm662_vm4, %v2228_v38, %v2149_v34 }
0x171d   :  { %4829 = vmatmul.mubr.msk.f32.vlgmr.msra.gmra.mrb[24].mxu0 %vm135_vm1, %v2229_v40  ;;  %v2372_v42 = vpop.f32.mrb[24].mxu1 }
0x171e   :  { %v4837_v43 = vpop.f32.mrb[25].mxu1  ;;  %4839 = vmatpush3.xpose.msk.msra.mxu0 %vm135_vm1, %v5491_v25  ;;  %4840 = vmatprep.mubr.msk.f32.mxu0 %vm5323_vm0, %v5324_v1 }
0x171f   :  { %4848 = vmatprep.subr.mxu0 %v5324_v1 }
0x17f0   :  { %v2298_v44 = vpop.f32.mrb[24].mxu0 }
0x17f1   :  { %v2373_v45 = vadd.f32 %v2372_v42, %v2298_v44  ;;  %v4830_v46 = vpop.f32.mrb[25].mxu0 }
0x17f3   :  { %v2376_v50 = vadd.f32 %v5483_v9, %v2373_v45 }
0x17f5   :  { %5108 = vtanh.f32 %v2376_v50  ;;  %v4533_v24 = vmul.f32 -1.442695, %v2376_v50 }
0x17f7   :  { %5110 = vpow2.f32 %v4533_v24 }
0x17ff   :  { %v5109_v51 = vpop.eup %5108 }
0x1800   :  { %2386 = vrot.lane.b32.xlu1 %v5109_v51, %s5325_s6 }
0x1801   :  { %v5111_v52 = vpop.eup %5110 }
0x1802   :  { %v2380_v53 = vadd.f32 1.0, %v5111_v52  ;;  %v5782_v52 = vld [vmem:[#allocation8] ss:$0 sm:$0xff] }
0x1804   :  { %5112 = vrcp.f32 %v2380_v53 }
0x180e   :  { %v5113_v55 = vpop.eup %5112 }
0x180f   :  { %v2384_v57 = vmul.f32 %v5113_v55, %v5676_v54 }
0x1872   :  { %v2387_v56 = vpop.permute.xlu1 %2386 }
0x1873   :  { %v2389_v41 = vmul.f32 %v5113_v55, %v2387_v56 }
0x1875   :  { %2391 = vrot.lane.b32.xlu1 %v2389_v41, %s5326_s17 }
0x18e7   :  { %v2392_v58 = vpop.permute.xlu1 %2391 }
0x18e8   :  { %v5731_v59 = vadd.f32 %v2392_v58, %v2384_v57 }
0x18ea   :  { %5114 = vtanh.f32 %v5731_v59 }
0x18f4   :  { %v5115_v9 = vpop.eup %5114 }
0x18f5   :  { %2397 = vrot.lane.b32.xlu0 %v5115_v9, %s5327_s18 }
0x1967   :  { %v2398_v60 = vpop.permute.xlu0 %2397 }
0x1968   :  { %v2400_v61 = vmul.f32 %v5113_v55, %v2398_v60 }
0x196a   :  { %v2408_v49 = vrot.slane %v2400_v61, %v5502_v33 }
0x196c   :  { %v2409_v62 = vcombine.high %v2408_v49, %v2408_v49  ;;  %v2416_v63 = vrot.slane %v2408_v49, %v5502_v33 }
0x196e   :  { %v2427_v2 = vrot.slane %v2416_v63, %v5505_v37  ;;  %v2423_v3 = vrot.slane %v2409_v62, %v5502_v33 }
0x1970   :  { %2428 = vrot.lane.b32.xlu0 %v2427_v2, %s5329_s30  ;;  %v2505_v54 = vrot.slane %v2423_v3, %v5505_v37 }
0x1972   :  { %2506 = vrot.lane.b32.xlu1 %v2505_v54, %s5329_s30 }
0x19e2   :  { %v2429_v4 = vpop.permute.xlu0 %2428 }
0x19e3   :  { %4841 = vmatmul.mubr.msk.f32.vlgmr.msra.gmra.mrb[26].mxu0 %vm135_vm1, %v2429_v4 }
0x19e4   :  { %v2507_v6 = vpop.permute.xlu1 %2506  ;;  %4849 = vmatpush3.msra.mxu0 %v5491_v25  ;;  %4850 = vmatprep.mubr.msk.f32.mxu0 %vm5323_vm0, %v5324_v1 }
0x19e5   :  { %4846 = vmatmul.mubr.msk.f32.vlgmr.msra.gmra.mrb[26].mxu1 %vm135_vm1, %v2507_v6  ;;  %5004 = vmatprep.subr.bf16.mxu0 %v5322_v0 }
0x19e6   :  { %4854 = vmatpush3.msra.mxu1 %v5493_v26  ;;  %4855 = vmatprep.mubr.msk.f32.mxu1 %vm5323_vm0, %v5324_v1 }
0x19e7   :  { %5007 = vmatprep.subr.bf16.mxu1 %v5322_v0 }
0x1ab6   :  { %v2498_v8 = vpop.f32.mrb[26].mxu0 }
0x1ab7   :  { %v2499_v10 = vadd.f32 %v2498_v8, %v5527_v47  ;;  %v4842_v11 = vpop.f32.mrb[27].mxu0 }
0x1ab8   :  { %v2576_v12 = vpop.f32.mrb[26].mxu1 }
0x1ab9   :  { %v2577_v13 = vadd.f32 %v2576_v12, %v5530_v48  ;;  %v4847_v14 = vpop.f32.mrb[27].mxu1  ;;  %v2580_v15 = vsel %vm489_vm2, %v2499_v10, -inf  ;;  %v5800_v12 = vld [vmem:[#allocation2] sm:$0xff] }
0x1aba   :  { %2581 = vmax.xlane.f32.xlu0 %v2580_v15 }
0x1abb   :  { %v2583_v16 = vsel %vm489_vm2, %v2577_v13, -inf }
0x1abc   :  { %2584 = vmax.xlane.f32.xlu1 %v2583_v16 }
0x1b47   :  { %v2582_v17 = vpop.xlane.xlu0 %2581 }
0x1b48   :  { %v2586_v18 = vsub.f32 %v2499_v10, %v2582_v17 }
0x1b49   :  { %v2585_v19 = vpop.xlane.xlu1 %2584 }
0x1b4a   :  { %v2588_v20 = vmul.f32 1.442695, %v2586_v18  ;;  %v2587_v21 = vsub.f32 %v2577_v13, %v2585_v19  ;;  %v5807_v13 = vld [vmem:[#allocation2 + $0x8] sm:$0xff] }
0x1b4c   :  { %5116 = vpow2.f32 %v2588_v20  ;;  %v2590_v22 = vmul.f32 1.442695, %v2587_v21 }
0x1b4e   :  { %5118 = vpow2.f32 %v2590_v22 }
0x1b56   :  { %v5117_v23 = vpop.eup %5116 }
0x1b57   :  { %v2592_v27 = vsel %vm489_vm2, %v5117_v23, 0.0 }
0x1b58   :  { %v5119_v28 = vpop.eup %5118  ;;  %2593 = vadd.xlane.f32.xlu1 %v2592_v27 }
0x1b59   :  { %v2595_v29 = vsel %vm489_vm2, %v5119_v28, 0.0 }
0x1b5a   :  { %2596 = vadd.xlane.f32.xlu0 %v2595_v29 }
0x1b70   :  { %2824 = vrot.lane.b32.xlu0 %v2400_v61, %s5329_s30 }
0x1be5   :  { %v2594_v30 = vpop.xlane.xlu1 %2593 }
0x1be6   :  { %5120 = vrcp.f32 %v2594_v30 }
0x1be7   :  { %v2597_v31 = vpop.xlane.xlu0 %2596 }
0x1be8   :  { %5122 = vrcp.f32 %v2597_v31 }
0x1beb   :  { %v2825_v38 = vpop.permute.xlu0 %2824 }
0x1bf0   :  { %v5121_v32 = vpop.eup %5120 }
0x1bf1   :  { %v2600_v34 = vmul.f32 %v5121_v32, %v5117_v23 }
0x1bf2   :  { %v5123_v35 = vpop.eup %5122 }
0x1bf3   :  { %v2601_v36 = vmul.f32 %v5123_v35, %v5119_v28  ;;  %4851 = vmatmul.mubr.msk.f32.vlgmr.msra.gmra.mrb[28].mxu0 %vm512_vm3, %v2600_v34 }
0x1bf4   :  { %5006 = vmatpush3.bf16.msra.mxu0 %v5469_v5  ;;  %4862 = vmatprep.mubr.msk.f32.mxu0 %vm5323_vm0, %v5324_v1 }
0x1bf5   :  { %4856 = vmatmul.mubr.msk.f32.vlgmr.msra.gmra.mrb[28].mxu1 %vm512_vm3, %v2601_v36  ;;  %4872 = vmatprep.subr.mxu0 %v5324_v1 }
0x1bf6   :  { %5009 = vmatpush3.bf16.msra.mxu1 %v5471_v7  ;;  %4869 = vmatprep.mubr.msk.f32.mxu1 %vm5323_vm0, %v5324_v1 }
0x1bf7   :  { %4877 = vmatprep.subr.mxu1 %v5324_v1 }
0x1bf9   :  { %4870 = vmatmul.mubr.msk.f32.vlgmr.msra.gmra.mrb[30].mxu1 %vm135_vm1, %v2825_v38 }
0x1bfa   :  { %4879 = vmatprep.mubr.msk.f32.mxu1 %vm5323_vm0, %v5324_v1 }
0x1bff   :  { %4878 = vmatpush3.xpose.msk.msra.mxu1 %vm135_vm1, %v5493_v26 }
0x1c00   :  { %4887 = vmatprep.subr.mxu1 %v5324_v1 }
0x1cc6   :  { %v2671_v39 = vpop.f32.mrb[28].mxu0 }
0x1cc7   :  { %v4852_v40 = vpop.f32.mrb[29].mxu0 }
0x1cc8   :  { %v2744_v42 = vpop.f32.mrb[28].mxu1 }
0x1cc9   :  { %v2750_v43 = vrot.slane %v2744_v42, 7  ;;  %v4857_v44 = vpop.f32.mrb[29].mxu1 }
0x1ccb   :  { %v2751_v45 = vsel %vm662_vm4, %v2750_v43, %v2671_v39 }
0x1ccc   :  { %4863 = vmatmul.mubr.msk.f32.vlgmr.msra.gmra.mrb[30].mxu0 %vm135_vm1, %v2751_v45  ;;  %v2894_v46 = vpop.f32.mrb[30].mxu1 }
0x1ccd   :  { %v4871_v50 = vpop.f32.mrb[31].mxu1  ;;  %4873 = vmatpush3.xpose.msk.msra.mxu0 %vm135_vm1, %v5491_v25  ;;  %4874 = vmatprep.mubr.msk.f32.mxu0 %vm5323_vm0, %v5324_v1 }
0x1cce   :  { %4882 = vmatprep.subr.mxu0 %v5324_v1 }
0x1d9f   :  { %v2820_v26 = vpop.f32.mrb[30].mxu0 }
0x1da0   :  { %v2895_v51 = vadd.f32 %v2894_v46, %v2820_v26  ;;  %v4864_v24 = vpop.f32.mrb[31].mxu0 }
0x1da2   :  { %v2898_v53 = vadd.f32 %v5782_v52, %v2895_v51 }
0x1da4   :  { %5124 = vtanh.f32 %v2898_v53  ;;  %v4542_v56 = vmul.f32 -1.442695, %v2898_v53 }
0x1da6   :  { %5126 = vpow2.f32 %v4542_v56 }
0x1dae   :  { %v5125_v55 = vpop.eup %5124 }
0x1daf   :  { %2908 = vrot.lane.b32.xlu1 %v5125_v55, %s5325_s6 }
0x1db0   :  { %v5127_v41 = vpop.eup %5126 }
0x1db1   :  { %v2902_v25 = vadd.f32 1.0, %v5127_v41 }
0x1db3   :  { %5128 = vrcp.f32 %v2902_v25 }
0x1dbd   :  { %v5129_v57 = vpop.eup %5128 }
0x1dbe   :  { %v2906_v60 = vmul.f32 %v5129_v57, %v5731_v59 }
0x1e21   :  { %v2909_v58 = vpop.permute.xlu1 %2908 }
0x1e22   :  { %v2911_v9 = vmul.f32 %v5129_v57, %v2909_v58 }
0x1e24   :  { %2913 = vrot.lane.b32.xlu1 %v2911_v9, %s5326_s17 }
0x1e96   :  { %v2914_v61 = vpop.permute.xlu1 %2913 }
0x1e97   :  { %v5788_v49 = vadd.f32 %v2914_v61, %v2906_v60 }
0x1e99   :  { %5130 = vtanh.f32 %v5788_v49 }
0x1ea3   :  { %v5131_v62 = vpop.eup %5130 }
0x1ea4   :  { %2919 = vrot.lane.b32.xlu0 %v5131_v62, %s5327_s18 }
0x1f16   :  { %v2920_v63 = vpop.permute.xlu0 %2919 }
0x1f17   :  { %v2922_v2 = vmul.f32 %v5129_v57, %v2920_v63 }
0x1f19   :  { %v2930_v3 = vrot.slane %v2922_v2, %v5502_v33 }
0x1f1b   :  { %v2931_v54 = vcombine.high %v2930_v3, %v2930_v3  ;;  %v2938_v4 = vrot.slane %v2930_v3, %v5502_v33 }
0x1f1d   :  { %v2949_v6 = vrot.slane %v2938_v4, %v5505_v37  ;;  %v2945_v8 = vrot.slane %v2931_v54, %v5502_v33 }
0x1f1f   :  { %2950 = vrot.lane.b32.xlu0 %v2949_v6, %s5329_s30  ;;  %v3027_v59 = vrot.slane %v2945_v8, %v5505_v37 }
0x1f21   :  { %3028 = vrot.lane.b32.xlu1 %v3027_v59, %s5329_s30 }
0x1f91   :  { %v2951_v10 = vpop.permute.xlu0 %2950 }
0x1f92   :  { %4875 = vmatmul.mubr.msk.f32.vlgmr.msra.gmra.mrb[32].mxu0 %vm135_vm1, %v2951_v10 }
0x1f93   :  { %v3029_v11 = vpop.permute.xlu1 %3028  ;;  %4883 = vmatpush3.msra.mxu0 %v5800_v12  ;;  %4884 = vmatprep.mubr.msk.f32.mxu0 %vm5323_vm0, %v5324_v1 }
0x1f94   :  { %4880 = vmatmul.mubr.msk.f32.vlgmr.msra.gmra.mrb[32].mxu1 %vm135_vm1, %v3029_v11  ;;  %5010 = vmatprep.subr.bf16.mxu0 %v5322_v0 }
0x1f95   :  { %4888 = vmatpush3.msra.mxu1 %v5807_v13  ;;  %4889 = vmatprep.mubr.msk.f32.mxu1 %vm5323_vm0, %v5324_v1 }
0x1f96   :  { %5013 = vmatprep.subr.bf16.mxu1 %v5322_v0 }
0x2065   :  { %v3020_v14 = vpop.f32.mrb[32].mxu0 }
0x2066   :  { %v3021_v15 = vadd.f32 %v3020_v14, %v5527_v47  ;;  %v4876_v16 = vpop.f32.mrb[33].mxu0 }
0x2067   :  { %v3098_v17 = vpop.f32.mrb[32].mxu1 }
0x2068   :  { %v3099_v18 = vadd.f32 %v3098_v17, %v5530_v48  ;;  %v4881_v19 = vpop.f32.mrb[33].mxu1  ;;  %v3102_v20 = vsel %vm489_vm2, %v3021_v15, -inf }
0x2069   :  { %3103 = vmax.xlane.f32.xlu0 %v3102_v20 }
0x206a   :  { %v3105_v21 = vsel %vm489_vm2, %v3099_v18, -inf }
0x206b   :  { %3106 = vmax.xlane.f32.xlu1 %v3105_v21 }
0x20f6   :  { %v3104_v22 = vpop.xlane.xlu0 %3103 }
0x20f7   :  { %v3108_v23 = vsub.f32 %v3021_v15, %v3104_v22 }
0x20f8   :  { %v3107_v27 = vpop.xlane.xlu1 %3106 }
0x20f9   :  { %v3110_v28 = vmul.f32 1.442695, %v3108_v23  ;;  %v3109_v29 = vsub.f32 %v3099_v18, %v3107_v27 }
0x20fb   :  { %5132 = vpow2.f32 %v3110_v28  ;;  %v3112_v30 = vmul.f32 1.442695, %v3109_v29 }
0x20fd   :  { %5134 = vpow2.f32 %v3112_v30 }
0x2105   :  { %v5133_v31 = vpop.eup %5132 }
0x2106   :  { %v3114_v32 = vsel %vm489_vm2, %v5133_v31, 0.0 }
0x2107   :  { %v5135_v34 = vpop.eup %5134  ;;  %3115 = vadd.xlane.f32.xlu1 %v3114_v32 }
0x2108   :  { %v3117_v35 = vsel %vm489_vm2, %v5135_v34, 0.0 }
0x2109   :  { %3118 = vadd.xlane.f32.xlu0 %v3117_v35 }
0x211f   :  { %3346 = vrot.lane.b32.xlu0 %v2922_v2, %s5329_s30 }
0x2194   :  { %v3116_v36 = vpop.xlane.xlu1 %3115 }
0x2195   :  { %5136 = vrcp.f32 %v3116_v36 }
0x2196   :  { %v3119_v38 = vpop.xlane.xlu0 %3118 }
0x2197   :  { %5138 = vrcp.f32 %v3119_v38 }
0x219a   :  { %v3347_v44 = vpop.permute.xlu0 %3346 }
0x219f   :  { %v5137_v39 = vpop.eup %5136 }
0x21a0   :  { %v3122_v40 = vmul.f32 %v5137_v39, %v5133_v31 }
0x21a1   :  { %v5139_v42 = vpop.eup %5138 }
0x21a2   :  { %v3123_v43 = vmul.f32 %v5139_v42, %v5135_v34  ;;  %4885 = vmatmul.mubr.msk.f32.vlgmr.msra.gmra.mrb[34].mxu0 %vm512_vm3, %v3122_v40 }
0x21a3   :  { %5012 = vmatpush3.bf16.msra.mxu0 %v5469_v5  ;;  %4896 = vmatprep.mubr.msk.f32.mxu0 %vm5323_vm0, %v5324_v1 }
0x21a4   :  { %4890 = vmatmul.mubr.msk.f32.vlgmr.msra.gmra.mrb[34].mxu1 %vm512_vm3, %v3123_v43  ;;  %4906 = vmatprep.subr.mxu0 %v5324_v1 }
0x21a5   :  { %5015 = vmatpush3.bf16.msra.mxu1 %v5471_v7  ;;  %4903 = vmatprep.mubr.msk.f32.mxu1 %vm5323_vm0, %v5324_v1 }
0x21a6   :  { %4911 = vmatprep.subr.mxu1 %v5324_v1 }
0x21a8   :  { %4904 = vmatmul.mubr.msk.f32.vlgmr.msra.gmra.mrb[36].mxu1 %vm135_vm1, %v3347_v44 }
0x21a9   :  { %4913 = vmatprep.mubr.msk.f32.mxu1 %vm5323_vm0, %v5324_v1 }
0x21ae   :  { %4912 = vmatpush3.xpose.msk.msra.mxu1 %vm135_vm1, %v5807_v13 }
0x21af   :  { %4921 = vmatprep.subr.mxu1 %v5324_v1 }
0x2275   :  { %v3193_v45 = vpop.f32.mrb[34].mxu0 }
0x2276   :  { %v4886_v46 = vpop.f32.mrb[35].mxu0 }
0x2277   :  { %v3266_v50 = vpop.f32.mrb[34].mxu1 }
0x2278   :  { %v3272_v26 = vrot.slane %v3266_v50, 7  ;;  %v4891_v51 = vpop.f32.mrb[35].mxu1 }
0x227a   :  { %v3273_v24 = vsel %vm662_vm4, %v3272_v26, %v3193_v45 }
0x227b   :  { %4897 = vmatmul.mubr.msk.f32.vlgmr.msra.gmra.mrb[36].mxu0 %vm135_vm1, %v3273_v24  ;;  %v3416_v53 = vpop.f32.mrb[36].mxu1 }
0x227c   :  { %v4905_v55 = vpop.f32.mrb[37].mxu1  ;;  %4907 = vmatpush3.xpose.msk.msra.mxu0 %vm135_vm1, %v5800_v12  ;;  %4908 = vmatprep.mubr.msk.f32.mxu0 %vm5323_vm0, %v5324_v1 }
0x227d   :  { %4916 = vmatprep.subr.mxu0 %v5324_v1 }
0x234e   :  { %v3342_v56 = vpop.f32.mrb[36].mxu0 }
0x234f   :  { %v3417_v41 = vadd.f32 %v3416_v53, %v3342_v56  ;;  %v4898_v25 = vpop.f32.mrb[37].mxu0 }
0x2351   :  { %v3420_v57 = vadd.f32 %v5782_v52, %v3417_v41 }
0x2353   :  { %5140 = vtanh.f32 %v3420_v57  ;;  %v4551_v9 = vmul.f32 -1.442695, %v3420_v57 }
0x2355   :  { %5142 = vpow2.f32 %v4551_v9 }
0x235d   :  { %v5141_v58 = vpop.eup %5140 }
0x235e   :  { %3430 = vrot.lane.b32.xlu1 %v5141_v58, %s5325_s6 }
0x235f   :  { %v5143_v60 = vpop.eup %5142 }
0x2360   :  { %v3424_v61 = vadd.f32 1.0, %v5143_v60 }
0x2362   :  { %5144 = vrcp.f32 %v3424_v61 }
0x236c   :  { %v5145_v62 = vpop.eup %5144 }
0x236d   :  { %v3428_v3 = vmul.f32 %v5145_v62, %v5788_v49 }
0x23d0   :  { %v3431_v63 = vpop.permute.xlu1 %3430 }
0x23d1   :  { %v3433_v2 = vmul.f32 %v5145_v62, %v3431_v63 }
0x23d3   :  { %3435 = vrot.lane.b32.xlu1 %v3433_v2, %s5326_s17 }
0x2445   :  { %v3436_v54 = vpop.permute.xlu1 %3435 }
0x2446   :  { %v5847_v4 = vadd.f32 %v3436_v54, %v3428_v3 }
0x2448   :  { %5146 = vtanh.f32 %v5847_v4 }
0x2452   :  { %v5147_v6 = vpop.eup %5146 }
0x2453   :  { %3441 = vrot.lane.b32.xlu0 %v5147_v6, %s5327_s18 }
0x24c5   :  { %v3442_v8 = vpop.permute.xlu0 %3441 }
0x24c6   :  { %v3444_v59 = vmul.f32 %v5145_v62, %v3442_v8 }
0x24c8   :  { %v3452_v10 = vrot.slane %v3444_v59, %v5502_v33 }
0x24ca   :  { %v3453_v11 = vcombine.high %v3452_v10, %v3452_v10  ;;  %v3460_v14 = vrot.slane %v3452_v10, %v5502_v33 }
0x24cc   :  { %v3471_v15 = vrot.slane %v3460_v14, %v5505_v37  ;;  %v3467_v16 = vrot.slane %v3453_v11, %v5502_v33 }
0x24ce   :  { %3472 = vrot.lane.b32.xlu0 %v3471_v15, %s5329_s30  ;;  %v3549_v49 = vrot.slane %v3467_v16, %v5505_v37 }
0x24d0   :  { %3550 = vrot.lane.b32.xlu1 %v3549_v49, %s5329_s30 }
0x2540   :  { %v3473_v17 = vpop.permute.xlu0 %3472 }
0x2541   :  { %4909 = vmatmul.mubr.msk.f32.vlgmr.msra.gmra.mrb[38].mxu0 %vm135_vm1, %v3473_v17 }
0x2542   :  { %v3551_v18 = vpop.permute.xlu1 %3550  ;;  %4917 = vmatpush3.msra.mxu0 %v5800_v12  ;;  %4918 = vmatprep.mubr.msk.f32.mxu0 %vm5323_vm0, %v5324_v1 }
0x2543   :  { %4914 = vmatmul.mubr.msk.f32.vlgmr.msra.gmra.mrb[38].mxu1 %vm135_vm1, %v3551_v18  ;;  %5016 = vmatprep.subr.bf16.mxu0 %v5322_v0 }
0x2544   :  { %4922 = vmatpush3.msra.mxu1 %v5807_v13  ;;  %4923 = vmatprep.mubr.msk.f32.mxu1 %vm5323_vm0, %v5324_v1 }
0x2545   :  { %5019 = vmatprep.subr.bf16.mxu1 %v5322_v0 }
0x2614   :  { %v3542_v19 = vpop.f32.mrb[38].mxu0 }
0x2615   :  { %v3543_v20 = vadd.f32 %v3542_v19, %v5527_v47  ;;  %v4910_v21 = vpop.f32.mrb[39].mxu0 }
0x2616   :  { %v3620_v22 = vpop.f32.mrb[38].mxu1 }
0x2617   :  { %v3621_v23 = vadd.f32 %v3620_v22, %v5530_v48  ;;  %v4915_v27 = vpop.f32.mrb[39].mxu1  ;;  %v3624_v28 = vsel %vm489_vm2, %v3543_v20, -inf }
0x2618   :  { %3625 = vmax.xlane.f32.xlu0 %v3624_v28 }
0x2619   :  { %v3627_v29 = vsel %vm489_vm2, %v3621_v23, -inf }
0x261a   :  { %3628 = vmax.xlane.f32.xlu1 %v3627_v29 }
0x26a5   :  { %v3626_v30 = vpop.xlane.xlu0 %3625 }
0x26a6   :  { %v3630_v31 = vsub.f32 %v3543_v20, %v3626_v30 }
0x26a7   :  { %v3629_v32 = vpop.xlane.xlu1 %3628 }
0x26a8   :  { %v3632_v34 = vmul.f32 1.442695, %v3630_v31  ;;  %v3631_v35 = vsub.f32 %v3621_v23, %v3629_v32 }
0x26aa   :  { %5148 = vpow2.f32 %v3632_v34  ;;  %v3634_v36 = vmul.f32 1.442695, %v3631_v35 }
0x26ac   :  { %5150 = vpow2.f32 %v3634_v36 }
0x26b4   :  { %v5149_v38 = vpop.eup %5148 }
0x26b5   :  { %v3636_v39 = vsel %vm489_vm2, %v5149_v38, 0.0 }
0x26b6   :  { %v5151_v40 = vpop.eup %5150  ;;  %3637 = vadd.xlane.f32.xlu1 %v3636_v39  ;;  %v4314_v39 = vld [vmem:[%s5962_s5] sm:$0xff] }
0x26b7   :  { %v3639_v42 = vsel %vm489_vm2, %v5151_v40, 0.0 }
0x26b8   :  { %3640 = vadd.xlane.f32.xlu0 %v3639_v42 }
0x26ce   :  { %3868 = vrot.lane.b32.xlu0 %v3444_v59, %s5329_s30 }
0x2743   :  { %v3638_v43 = vpop.xlane.xlu1 %3637 }
0x2744   :  { %5152 = vrcp.f32 %v3638_v43 }
0x2745   :  { %v3641_v44 = vpop.xlane.xlu0 %3640 }
0x2746   :  { %5154 = vrcp.f32 %v3641_v44 }
0x2749   :  { %v3869_v51 = vpop.permute.xlu0 %3868 }
0x274e   :  { %v5153_v45 = vpop.eup %5152 }
0x274f   :  { %v3644_v46 = vmul.f32 %v5153_v45, %v5149_v38 }
0x2750   :  { %v5155_v50 = vpop.eup %5154 }
0x2751   :  { %v3645_v26 = vmul.f32 %v5155_v50, %v5151_v40  ;;  %4919 = vmatmul.mubr.msk.f32.vlgmr.msra.gmra.mrb[40].mxu0 %vm512_vm3, %v3644_v46  ;;  %v4315_v40 = vld [vmem:[%s5962_s5 + $0x8] sm:$0xff] }
0x2752   :  { %5018 = vmatpush3.bf16.msra.mxu0 %v5469_v5  ;;  %4930 = vmatprep.mubr.msk.f32.mxu0 %vm5323_vm0, %v5324_v1  ;;  %v5026_v45 = vpack.c.bf16 %v4315_v40, %v4314_v39 }
0x2753   :  { %4924 = vmatmul.mubr.msk.f32.vlgmr.msra.gmra.mrb[40].mxu1 %vm512_vm3, %v3645_v26  ;;  %4940 = vmatprep.subr.mxu0 %v5324_v1  ;;  %v4316_v26 = vld [vmem:[#allocation10] sm:$0xff] }
0x2754   :  { %5021 = vmatpush3.bf16.msra.mxu1 %v5471_v7  ;;  %4937 = vmatprep.mubr.msk.f32.mxu1 %vm5323_vm0, %v5324_v1 }
0x2755   :  { %4945 = vmatprep.subr.mxu1 %v5324_v1 }
0x2757   :  { %4938 = vmatmul.mubr.msk.f32.vlgmr.msra.gmra.mrb[42].mxu1 %vm135_vm1, %v3869_v51  ;;  %v4317_v51 = vld [vmem:[#allocation10 + $0x8] sm:$0xff] }
0x2758   :  { %4947 = vmatprep.mubr.msk.f32.mxu1 %vm5323_vm0, %v5324_v1 }
0x275d   :  { %4946 = vmatpush3.xpose.msk.msra.mxu1 %vm135_vm1, %v5807_v13 }
0x275e   :  { %4955 = vmatprep.subr.mxu1 %v5324_v1 }
0x2824   :  { %v3715_v5 = vpop.f32.mrb[40].mxu0 }
0x2825   :  { %v4920_v24 = vpop.f32.mrb[41].mxu0 }
0x2826   :  { %v3788_v53 = vpop.f32.mrb[40].mxu1 }
0x2827   :  { %v3794_v7 = vrot.slane %v3788_v53, 7  ;;  %v4925_v55 = vpop.f32.mrb[41].mxu1 }
0x2829   :  { %v3795_v56 = vsel %vm662_vm4, %v3794_v7, %v3715_v5  ;;  %v5023_v5 = vpack.c.bf16 %v4317_v51, %v4316_v26 }
0x282a   :  { %4931 = vmatmul.mubr.msk.f32.vlgmr.msra.gmra.mrb[42].mxu0 %vm135_vm1, %v3795_v56  ;;  %v3938_v41 = vpop.f32.mrb[42].mxu1 }
0x282b   :  { %v4939_v25 = vpop.f32.mrb[43].mxu1  ;;  %4941 = vmatpush3.xpose.msk.msra.mxu0 %vm135_vm1, %v5800_v12  ;;  %4942 = vmatprep.mubr.msk.f32.mxu0 %vm5323_vm0, %v5324_v1 }
0x282c   :  { %4950 = vmatprep.subr.mxu0 %v5324_v1 }
0x28fd   :  { %v3864_v57 = vpop.f32.mrb[42].mxu0 }
0x28fe   :  { %v3939_v58 = vadd.f32 %v3938_v41, %v3864_v57  ;;  %v4932_v9 = vpop.f32.mrb[43].mxu0 }
0x2900   :  { %v3942_v60 = vadd.f32 %v5782_v52, %v3939_v58 }
0x2902   :  { %5156 = vtanh.f32 %v3942_v60  ;;  %v4560_v62 = vmul.f32 -1.442695, %v3942_v60 }
0x2904   :  { %5158 = vpow2.f32 %v4560_v62 }
0x290c   :  { %v5157_v61 = vpop.eup %5156 }
0x290d   :  { %3952 = vrot.lane.b32.xlu1 %v5157_v61, %s5325_s6 }
0x290e   :  { %v5159_v63 = vpop.eup %5158 }
0x290f   :  { %v3946_v2 = vadd.f32 1.0, %v5159_v63 }
0x2911   :  { %5160 = vrcp.f32 %v3946_v2 }
0x291b   :  { %v5161_v3 = vpop.eup %5160 }
0x291c   :  { %v3950_v8 = vmul.f32 %v5161_v3, %v5847_v4 }
0x297f   :  { %v3953_v54 = vpop.permute.xlu1 %3952 }
0x2980   :  { %v3955_v6 = vmul.f32 %v5161_v3, %v3953_v54 }
0x2982   :  { %3957 = vrot.lane.b32.xlu1 %v3955_v6, %s5326_s17 }
0x29f4   :  { %v3958_v59 = vpop.permute.xlu1 %3957 }
0x29f5   :  { %v3960_v10 = vadd.f32 %v3958_v59, %v3950_v8 }
0x29f7   :  { %5162 = vtanh.f32 %v3960_v10 }
0x2a01   :  { %v5163_v52 = vpop.eup %5162 }
0x2a02   :  { %3963 = vrot.lane.b32.xlu0 %v5163_v52, %s5327_s18 }
0x2a74   :  { %v3964_v11 = vpop.permute.xlu0 %3963 }
0x2a75   :  { %v3966_v14 = vmul.f32 %v5161_v3, %v3964_v11 }
0x2a77   :  { %v3974_v15 = vrot.slane %v3966_v14, %v5502_v33 }
0x2a79   :  { %v3975_v16 = vcombine.high %v3974_v15, %v3974_v15  ;;  %v3982_v49 = vrot.slane %v3974_v15, %v5502_v33 }
0x2a7b   :  { %v3993_v17 = vrot.slane %v3982_v49, %v5505_v37  ;;  %v3989_v18 = vrot.slane %v3975_v16, %v5502_v33 }
0x2a7d   :  { %3994 = vrot.lane.b32.xlu0 %v3993_v17, %s5329_s30  ;;  %v4071_v4 = vrot.slane %v3989_v18, %v5505_v37 }
0x2a7f   :  { %4072 = vrot.lane.b32.xlu1 %v4071_v4, %s5329_s30 }
0x2aef   :  { %v3995_v19 = vpop.permute.xlu0 %3994 }
0x2af0   :  { %4943 = vmatmul.mubr.msk.f32.vlgmr.msra.gmra.mrb[44].mxu0 %vm135_vm1, %v3995_v19 }
0x2af1   :  { %v4073_v20 = vpop.permute.xlu1 %4072  ;;  %4951 = vmatpush3.msra.mxu0 %v5800_v12  ;;  %4952 = vmatprep.mubr.msk.f32.mxu0 %vm5323_vm0, %v5324_v1 }
0x2af2   :  { %4948 = vmatmul.mubr.msk.f32.vlgmr.msra.gmra.mrb[44].mxu1 %vm135_vm1, %v4073_v20  ;;  %5022 = vmatprep.subr.bf16.mxu0 %v5322_v0 }
0x2af3   :  { %4956 = vmatpush3.msra.mxu1 %v5807_v13  ;;  %4957 = vmatprep.mubr.msk.f32.mxu1 %vm5323_vm0, %v5324_v1 }
0x2af4   :  { %5025 = vmatprep.subr.bf16.mxu1 %v5322_v0 }
0x2bc3   :  { %v4064_v33 = vpop.f32.mrb[44].mxu0 }
0x2bc4   :  { %v4065_v37 = vadd.f32 %v4064_v33, %v5527_v47  ;;  %v4944_v21 = vpop.f32.mrb[45].mxu0 }
0x2bc5   :  { %v4142_v22 = vpop.f32.mrb[44].mxu1 }
0x2bc6   :  { %v4143_v12 = vadd.f32 %v4142_v22, %v5530_v48  ;;  %v4949_v23 = vpop.f32.mrb[45].mxu1  ;;  %v4146_v27 = vsel %vm489_vm2, %v4065_v37, -inf }
0x2bc7   :  { %4147 = vmax.xlane.f32.xlu0 %v4146_v27 }
0x2bc8   :  { %v4149_v28 = vsel %vm489_vm2, %v4143_v12, -inf }
0x2bc9   :  { %4150 = vmax.xlane.f32.xlu1 %v4149_v28 }
0x2c54   :  { %v4148_v13 = vpop.xlane.xlu0 %4147 }
0x2c55   :  { %v4152_v29 = vsub.f32 %v4065_v37, %v4148_v13 }
0x2c56   :  { %v4151_v30 = vpop.xlane.xlu1 %4150 }
0x2c57   :  { %v4154_v31 = vmul.f32 1.442695, %v4152_v29  ;;  %v4153_v32 = vsub.f32 %v4143_v12, %v4151_v30 }
0x2c59   :  { %5164 = vpow2.f32 %v4154_v31  ;;  %v4156_v0 = vmul.f32 1.442695, %v4153_v32 }
0x2c5b   :  { %5166 = vpow2.f32 %v4156_v0 }
0x2c63   :  { %v5165_v47 = vpop.eup %5164 }
0x2c64   :  { %v4158_v34 = vsel %vm489_vm2, %v5165_v47, 0.0 }
0x2c65   :  { %v5167_v35 = vpop.eup %5166  ;;  %4159 = vadd.xlane.f32.xlu1 %v4158_v34 }
0x2c66   :  { %v4161_v48 = vsel %vm489_vm2, %v5167_v35, 0.0 }
0x2c67   :  { %4162 = vadd.xlane.f32.xlu0 %v4161_v48 }
0x2c7d   :  { %4394 = vrot.lane.b32.xlu0 %v3966_v14, %s5329_s30 }
0x2cf2   :  { %v4160_v36 = vpop.xlane.xlu1 %4159 }
0x2cf3   :  { %5168 = vrcp.f32 %v4160_v36 }
0x2cf4   :  { %v4163_v38 = vpop.xlane.xlu0 %4162 }
0x2cf5   :  { %5170 = vrcp.f32 %v4163_v38 }
0x2cf8   :  { %v4395_v50 = vpop.permute.xlu0 %4394 }
0x2cfd   :  { %v5169_v42 = vpop.eup %5168 }
0x2cfe   :  { %v4166_v43 = vmul.f32 %v5169_v42, %v5165_v47 }
0x2cff   :  { %v5171_v44 = vpop.eup %5170 }
0x2d00   :  { %v4167_v46 = vmul.f32 %v5171_v44, %v5167_v35  ;;  %4953 = vmatmul.mubr.msk.f32.vlgmr.msra.gmra.mrb[46].mxu0 %vm512_vm3, %v4166_v43 }
0x2d01   :  { %4964 = vmatprep.mubr.msk.f32.mxu0 %vm5323_vm0, %v5324_v1  ;;  %5024 = vmatpush3.bf16.msra.mxu0 %v5023_v5 }
0x2d02   :  { %4958 = vmatmul.mubr.msk.f32.vlgmr.msra.gmra.mrb[46].mxu1 %vm512_vm3, %v4167_v46 }
0x2d03   :  { %5027 = vmatpush3.bf16.msra.mxu1 %v5026_v45  ;;  %4971 = vmatprep.mubr.msk.f32.mxu1 %vm5323_vm0, %v5324_v1  ;;  %v4569_v1 = vld [vmem:[%s5964_s7] ss:$0 sm:$0xff] }
0x2d06   :  { %4972 = vmatmul.mubr.msk.f32.vlgmr.msra.gmra.mrb[48].mxu1 %vm135_vm1, %v4395_v50 }
0x2dd3   :  { %v4237_v24 = vpop.f32.mrb[46].mxu0 }
0x2dd4   :  { %v4954_v53 = vpop.f32.mrb[47].mxu0 }
0x2dd5   :  { %v4310_v7 = vpop.f32.mrb[46].mxu1 }
0x2dd6   :  { %v4320_v55 = vrot.slane %v4310_v7, 7  ;;  %v4959_v56 = vpop.f32.mrb[47].mxu1 }
0x2dd8   :  { %v4321_v41 = vsel %vm662_vm4, %v4320_v55, %v4237_v24 }
0x2dd9   :  { %4965 = vmatmul.mubr.msk.f32.vlgmr.msra.gmra.mrb[48].mxu0 %vm135_vm1, %v4321_v41  ;;  %v4464_v25 = vpop.f32.mrb[48].mxu1 }
0x2dda   :  { %v4973_v57 = vpop.f32.mrb[49].mxu1 }
0x2eac   :  { %v4390_v58 = vpop.f32.mrb[48].mxu0 }
0x2ead   :  { %v4465_v9 = vadd.f32 %v4464_v25, %v4390_v58  ;;  %v4966_v60 = vpop.f32.mrb[49].mxu0 }
0x2eaf   :  { %v4475_v61 = vadd.f32 %v4569_v1, %v4465_v9 }
0x2eb1   :  { %4477 = vst.msk [vmem:[#allocation11] sm:$0x3] %vm4476_vm5, %v4475_v61 }
0x2eb2   :  { %5296 = shalt.err (!%p5293_p2)
}
0x2eb3   :  { %s5297_s11 = scalar_lea.hbm %s5965_s8, 32 }
0x2eb4   :  { %p5298_p3 = scmp.ne.s32.totalorder %s5965_s8, %s5297_s11  ;;  %p5301_p4 = scmp.lt.u32.totalorder %s5297_s11, %s5965_s8 }
0x2eb6   :  { %p5303_p5 = pnand %p5301_p4, %p5298_p3 }
0x2eb8   :  { %5306 = shalt.err (!%p5303_p5)
}
0x2eb9   :  { %4487 = dma.vmem_to_hbm [thread:$0]  %s4485_s28, 32, %s5965_s8, [#allocation4]  }
0x2eba   :  { %5313 = dma.done.wait [#allocation4], 32  }
0x2ebb   :  { %5314 = vsyncadd [#allocation4], 4294967264 }
0x2ebc   :  { %4491 = vsyncpa [#allocation3], 1 }
0x2ebd   :  { %4492 = vsyncpa [#allocation6], 1 }
0x2ebe   :  { %4493 = vsyncpa [#allocation9], 1 }
0x2ebf   :  { %4494 = vsyncpa [#allocation4], 1 }

</bundles_post_ra>
